<compile_context>
chip_gen: v6e
topology: v6e:2x2x1
jax: 0.10.0
libtpu: 0.0.40
codegen_flags: <defaults>
</compile_context>

<pallas_src>
import jax
import jax.numpy as jnp
from jax import lax
from jax.experimental import pallas as pl
from jax.experimental.pallas import tpu as pltpu

# ---------------- model dimensions (small, consistent with the forward) -----
B, T, C, H, W = 2, 4, 3, 16, 16    # x: (B, T, C, H, W)
PATCH = 4
HP, WP = H // PATCH, W // PATCH
P = HP * WP                         # 16 tokens per frame (window covers all)
TP = T * P                          # 64 tokens per video
CP = C * PATCH * PATCH              # 48 patch feature size
D = 32                              # embed dim
HEADS = 2
HD = D // HEADS
MLP = 4 * D                         # 128
NC = 2                              # num_classes
EPS = 1e-5

# ---------------- packed parameter slab layout -------------------------------
SLAB_LANES = 128                    # lane width of both slabs (== MLP)

# weight slab: matrices stacked along the sublane axis, lane-padded to 128.
_W_SHAPES = ((CP, D), (D, 3 * D), (D, D), (D, MLP), (MLP, D), (D, NC))
_W_OFFS = []
_off = 0
for _r, _c in _W_SHAPES:
    _W_OFFS.append(_off)
    _off += _r
W_ROWS = _off                       # 304 rows (every offset is a multiple of 8)

# vector slab: every (1, width) bias / LN vector gets one row.
_V_NAMES = ("be", "ln0g", "ln0b", "bqkv", "bproj", "ln1g", "ln1b",
            "bfc1", "bfc2", "ln2g", "ln2b", "lnfg", "lnfb", "bc")
_V_WIDTH = dict(be=D, ln0g=D, ln0b=D, bqkv=3 * D, bproj=D, ln1g=D, ln1b=D,
                bfc1=MLP, bfc2=D, ln2g=D, ln2b=D, lnfg=D, lnfb=D, bc=NC)
_V_ROW = {name: i for i, name in enumerate(_V_NAMES)}
V_ROWS = 16                         # padded to a full sublane multiple


# ---------------- shared math (used by kernel and by the pure-JAX reference) -
def _ln(x, g, b):
    mu = jnp.mean(x, axis=-1, keepdims=True)
    var = jnp.mean(jnp.square(x - mu), axis=-1, keepdims=True)
    return (x - mu) * lax.rsqrt(var + EPS) * g + b


def _gelu(x):
    # TODO(synk): HF Swin uses exact erf-GELU; tanh approximation used here for
    # robust EUP lowering on TPU.
    return jax.nn.gelu(x, approximate=True)


def _video_forward(xp, params, recip):
    """One video's tokens (T*P, CP) -> (1, NC) logits (temporal mean over T)."""
    (we, be, ln0g, ln0b, wqkv, bqkv, wproj, bproj,
     ln1g, ln1b, wfc1, bfc1, wfc2, bfc2, ln2g, ln2b,
     lnfg, lnfb, wc, bc) = params

    # patch embedding (== Conv2d(k=PATCH, s=PATCH)) + LayerNorm, all frames at once
    h = jnp.dot(xp, we, preferred_element_type=jnp.float32) + be       # (TP, D)
    h = _ln(h, ln0g, ln0b)

    # windowed multi-head self-attention (window == full token grid of a frame)
    hn = _ln(h, ln1g, ln1b)
    qkv = jnp.dot(hn, wqkv, preferred_element_type=jnp.float32) + bqkv  # (TP, 3D)
    scale = 1.0 / (HD ** 0.5)
    heads = []
    for hh in range(HEADS):
        # frame-batched per-head attention: (T, P, HD) operands, 3-D einsums.
        qh = qkv[:, hh * HD:(hh + 1) * HD].reshape(T, P, HD)
        kh = qkv[:, D + hh * HD:D + (hh + 1) * HD].reshape(T, P, HD)
        vh = qkv[:, 2 * D + hh * HD:2 * D + (hh + 1) * HD].reshape(T, P, HD)
        s = jnp.einsum('tqd,tkd->tqk', qh, kh,
                       preferred_element_type=jnp.float32) * scale
        s = s - jnp.max(s, axis=-1, keepdims=True)
        e = jnp.exp(s)
        a = e * recip(jnp.sum(e, axis=-1, keepdims=True))
        oh = jnp.einsum('tqk,tkd->tqd', a, vh,
                        preferred_element_type=jnp.float32)
        heads.append(oh.reshape(TP, HD))
    attn = jnp.concatenate(heads, axis=-1)                              # (TP, D)
    attn = jnp.dot(attn, wproj, preferred_element_type=jnp.float32) + bproj
    h = h + attn

    # MLP block (pre-norm, residual)
    hn = _ln(h, ln2g, ln2b)
    m = jnp.dot(hn, wfc1, preferred_element_type=jnp.float32) + bfc1
    m = _gelu(m)
    m = jnp.dot(m, wfc2, preferred_element_type=jnp.float32) + bfc2
    h = h + m

    # final LN, per-frame token mean pool, classifier head, temporal mean
    h = _ln(h, lnfg, lnfb)
    pooled = jnp.mean(h.reshape(T, P, D), axis=1)                       # (T, D)
    logits = jnp.dot(pooled, wc, preferred_element_type=jnp.float32) + bc
    return jnp.mean(logits, axis=0, keepdims=True)                      # (1, NC)


# ---------------- Pallas kernel ----------------------------------------------
def _unpack_params(wref, vref):
    """Static slices of the packed slabs -> the 20-param tuple (loads only)."""
    w = []
    for off, (r, c) in zip(_W_OFFS, _W_SHAPES):
        w.append(wref[off:off + r, 0:c])
    we, wqkv, wproj, wfc1, wfc2, wc = w

    def vrow(name):
        i = _V_ROW[name]
        return vref[i:i + 1, 0:_V_WIDTH[name]]

    return (we, vrow("be"), vrow("ln0g"), vrow("ln0b"),
            wqkv, vrow("bqkv"), wproj, vrow("bproj"),
            vrow("ln1g"), vrow("ln1b"), wfc1, vrow("bfc1"),
            wfc2, vrow("bfc2"), vrow("ln2g"), vrow("ln2b"),
            vrow("lnfg"), vrow("lnfb"), wc, vrow("bc"))


def swin_video_kernel(tokens_ref, wslab_ref, vslab_ref, out_ref):
    params = _unpack_params(wslab_ref, vslab_ref)
    xp = tokens_ref[0]                                    # (TP, CP) one video
    logits = _video_forward(xp, params,
                            lambda s: pl.reciprocal(s, approx=True))
    out_ref[...] = logits.reshape(1, 1, NC)               # own output row


def swin_video_classifier(tokens, wslab, vslab):
    """tokens: (B, T*P, CP) f32 -> (B, NC) logits averaged over T."""
    out = pl.pallas_call(
        swin_video_kernel,
        out_shape=jax.ShapeDtypeStruct((B, 1, NC), jnp.float32),
        grid_spec=pltpu.PrefetchScalarGridSpec(
            num_scalar_prefetch=0,
            grid=(B,),
            in_specs=[
                pl.BlockSpec((1, TP, CP), lambda b: (b, 0, 0)),
                pl.BlockSpec((W_ROWS, SLAB_LANES), lambda b: (0, 0)),   # invariant
                pl.BlockSpec((V_ROWS, SLAB_LANES), lambda b: (0, 0)),   # invariant
            ],
            out_specs=pl.BlockSpec((1, 1, NC), lambda b: (b, 0, 0)),
        ),
        compiler_params=pltpu.CompilerParams(
            dimension_semantics=("parallel",)),           # v7x: 2 TCs usable
    )(tokens, wslab, vslab)
    return out.reshape(B, NC)


# ---------------- glue: patchify (NCHW -> tokens) and parameter packing ------
def patchify(x):
    # x: (B, T, C, H, W) -> (B, T*P, CP); row-major patch grid, channel-major
    # inside a patch (matches Conv2d(k=p, s=p) + flatten).
    xr = x.reshape(B * T, C, HP, PATCH, WP, PATCH)
    xr = xr.transpose(0, 2, 4, 1, 3, 5)                   # (N, HP, WP, C, p, p)
    return xr.reshape(B, TP, CP).astype(jnp.float32)


def pack_params(params):
    (we, be, ln0g, ln0b, wqkv, bqkv, wproj, bproj,
     ln1g, ln1b, wfc1, bfc1, wfc2, bfc2, ln2g, ln2b,
     lnfg, lnfb, wc, bc) = params
    weights = (we, wqkv, wproj, wfc1, wfc2, wc)
    wslab = jnp.zeros((W_ROWS, SLAB_LANES), jnp.float32)
    for off, wmat in zip(_W_OFFS, weights):
        r, c = wmat.shape
        wslab = wslab.at[off:off + r, 0:c].set(wmat)
    vecs = dict(be=be, ln0g=ln0g, ln0b=ln0b, bqkv=bqkv, bproj=bproj,
                ln1g=ln1g, ln1b=ln1b, bfc1=bfc1, bfc2=bfc2,
                ln2g=ln2g, ln2b=ln2b, lnfg=lnfg, lnfb=lnfb, bc=bc)
    vslab = jnp.zeros((V_ROWS, SLAB_LANES), jnp.float32)
    for name, v in vecs.items():
        i = _V_ROW[name]
        vslab = vslab.at[i:i + 1, 0:v.shape[-1]].set(v)
    return wslab, vslab


# ---------------- pure-JAX reference ------------------------------------------
def reference(x, params):
    tokens = patchify(x)                                  # (B, TP, CP)
    fwd = lambda xp: _video_forward(xp, params, lambda s: 1.0 / s)[0]
    return jax.vmap(fwd)(tokens)                          # (B, NC)


# ---------------- deterministic parameter init --------------------------------
def init_params():
    key = jax.random.PRNGKey(42)
    ks = jax.random.split(key, 6)
    nrm = lambda k, s: (0.02 * jax.random.normal(k, s)).astype(jnp.float32)
    zeros = lambda s: jnp.zeros(s, jnp.float32)
    ones = lambda s: jnp.ones(s, jnp.float32)
    return (
        nrm(ks[0], (CP, D)), zeros((1, D)),            # we, be
        ones((1, D)), zeros((1, D)),                   # ln0
        nrm(ks[1], (D, 3 * D)), zeros((1, 3 * D)),     # wqkv, bqkv
        nrm(ks[2], (D, D)), zeros((1, D)),             # wproj, bproj
        ones((1, D)), zeros((1, D)),                   # ln1
        nrm(ks[3], (D, MLP)), zeros((1, MLP)),         # wfc1, bfc1
        nrm(ks[4], (MLP, D)), zeros((1, D)),           # wfc2, bfc2
        ones((1, D)), zeros((1, D)),                   # ln2
        ones((1, D)), zeros((1, D)),                   # lnf
        nrm(ks[5], (D, NC)), zeros((1, NC)),           # wc, bc
    )


if __name__ == "__main__":
    params = init_params()
    x = jax.random.normal(jax.random.PRNGKey(0), (B, T, C, H, W), jnp.float32)

    tokens = patchify(x)
    wslab, vslab = pack_params(params)

    out = jax.block_until_ready(swin_video_classifier(tokens, wslab, vslab))
    ref = jax.block_until_ready(reference(x, params))

    assert out.shape == (B, NC), out.shape
    # tolerance slightly looser than 1e-4 because the in-kernel softmax uses
    # the EUP approximate reciprocal (pl.reciprocal(approx=True)).
    assert jnp.allclose(out, ref, atol=1e-3, rtol=1e-3), (out, ref)

    print("KERNEL_OK")
</pallas_src>

<mosaic_0001>
module attributes {stable_mosaic.version = 11 : i64} {
  func.func @swin_video_kernel(%arg0: i32, %arg1: memref<1x64x48xf32, #tpu.memory_space<vmem>>, %arg2: memref<304x128xf32, #tpu.memory_space<vmem>>, %arg3: memref<16x128xf32, #tpu.memory_space<vmem>>, %arg4: memref<1x1x2xf32, #tpu.memory_space<vmem>>) attributes {dimension_semantics = [#tpu.dimension_semantics<parallel>], iteration_bounds = array<i64: 2>, scalar_prefetch = 0 : i64, scratch_operands = 0 : i64, tpu.core_type = #tpu.core_type<tc>, window_params = [{transform_indices = @transform_0, window_bounds = array<i64: 1, 64, 48>}, {pipeline_mode = #tpu.pipeline_mode<synchronous>, transform_indices = @transform_1, window_bounds = array<i64: 304, 128>}, {pipeline_mode = #tpu.pipeline_mode<synchronous>, transform_indices = @transform_2, window_bounds = array<i64: 16, 128>}, {transform_indices = @transform_3, window_bounds = array<i64: 1, 1, 2>}]} {
    %c0 = arith.constant 0 : index
    %c0_0 = arith.constant 0 : index
    %0 = vector.load %arg2[%c0, %c0_0] : memref<304x128xf32, #tpu.memory_space<vmem>>, vector<48x32xf32>
    %c48 = arith.constant 48 : index
    %c0_1 = arith.constant 0 : index
    %1 = vector.load %arg2[%c48, %c0_1] : memref<304x128xf32, #tpu.memory_space<vmem>>, vector<32x96xf32>
    %c80 = arith.constant 80 : index
    %c0_2 = arith.constant 0 : index
    %2 = vector.load %arg2[%c80, %c0_2] : memref<304x128xf32, #tpu.memory_space<vmem>>, vector<32x32xf32>
    %c112 = arith.constant 112 : index
    %c0_3 = arith.constant 0 : index
    %3 = vector.load %arg2[%c112, %c0_3] : memref<304x128xf32, #tpu.memory_space<vmem>>, vector<32x128xf32>
    %c144 = arith.constant 144 : index
    %c0_4 = arith.constant 0 : index
    %4 = vector.load %arg2[%c144, %c0_4] : memref<304x128xf32, #tpu.memory_space<vmem>>, vector<128x32xf32>
    %c272 = arith.constant 272 : index
    %c0_5 = arith.constant 0 : index
    %5 = vector.load %arg2[%c272, %c0_5] : memref<304x128xf32, #tpu.memory_space<vmem>>, vector<32x2xf32>
    %c0_6 = arith.constant 0 : index
    %c0_7 = arith.constant 0 : index
    %6 = vector.load %arg3[%c0_6, %c0_7] : memref<16x128xf32, #tpu.memory_space<vmem>>, vector<1x32xf32>
    %c1 = arith.constant 1 : index
    %c0_8 = arith.constant 0 : index
    %7 = vector.load %arg3[%c1, %c0_8] : memref<16x128xf32, #tpu.memory_space<vmem>>, vector<1x32xf32>
    %c2 = arith.constant 2 : index
    %c0_9 = arith.constant 0 : index
    %8 = vector.load %arg3[%c2, %c0_9] : memref<16x128xf32, #tpu.memory_space<vmem>>, vector<1x32xf32>
    %c3 = arith.constant 3 : index
    %c0_10 = arith.constant 0 : index
    %9 = vector.load %arg3[%c3, %c0_10] : memref<16x128xf32, #tpu.memory_space<vmem>>, vector<1x96xf32>
    %c4 = arith.constant 4 : index
    %c0_11 = arith.constant 0 : index
    %10 = vector.load %arg3[%c4, %c0_11] : memref<16x128xf32, #tpu.memory_space<vmem>>, vector<1x32xf32>
    %c5 = arith.constant 5 : index
    %c0_12 = arith.constant 0 : index
    %11 = vector.load %arg3[%c5, %c0_12] : memref<16x128xf32, #tpu.memory_space<vmem>>, vector<1x32xf32>
    %c6 = arith.constant 6 : index
    %c0_13 = arith.constant 0 : index
    %12 = vector.load %arg3[%c6, %c0_13] : memref<16x128xf32, #tpu.memory_space<vmem>>, vector<1x32xf32>
    %c7 = arith.constant 7 : index
    %c0_14 = arith.constant 0 : index
    %13 = vector.load %arg3[%c7, %c0_14] : memref<16x128xf32, #tpu.memory_space<vmem>>, vector<1x128xf32>
    %c8 = arith.constant 8 : index
    %c0_15 = arith.constant 0 : index
    %14 = vector.load %arg3[%c8, %c0_15] : memref<16x128xf32, #tpu.memory_space<vmem>>, vector<1x32xf32>
    %c9 = arith.constant 9 : index
    %c0_16 = arith.constant 0 : index
    %15 = vector.load %arg3[%c9, %c0_16] : memref<16x128xf32, #tpu.memory_space<vmem>>, vector<1x32xf32>
    %c10 = arith.constant 10 : index
    %c0_17 = arith.constant 0 : index
    %16 = vector.load %arg3[%c10, %c0_17] : memref<16x128xf32, #tpu.memory_space<vmem>>, vector<1x32xf32>
    %c11 = arith.constant 11 : index
    %c0_18 = arith.constant 0 : index
    %17 = vector.load %arg3[%c11, %c0_18] : memref<16x128xf32, #tpu.memory_space<vmem>>, vector<1x32xf32>
    %c12 = arith.constant 12 : index
    %c0_19 = arith.constant 0 : index
    %18 = vector.load %arg3[%c12, %c0_19] : memref<16x128xf32, #tpu.memory_space<vmem>>, vector<1x32xf32>
    %c13 = arith.constant 13 : index
    %c0_20 = arith.constant 0 : index
    %19 = vector.load %arg3[%c13, %c0_20] : memref<16x128xf32, #tpu.memory_space<vmem>>, vector<1x2xf32>
    %c0_21 = arith.constant 0 : index
    %c0_22 = arith.constant 0 : index
    %c0_23 = arith.constant 0 : index
    %20 = vector.load %arg1[%c0_21, %c0_22, %c0_23] : memref<1x64x48xf32, #tpu.memory_space<vmem>>, vector<1x64x48xf32>
    %21 = vector.shape_cast %20 : vector<1x64x48xf32> to vector<64x48xf32>
    %cst = arith.constant dense<0.000000e+00> : vector<64x32xf32>
    %22 = tpu.matmul %21, %0, %cst {dimension_numbers = #tpu.dot_dimension_numbers<[1], [0], [0], [1], [0, 0, 1, 1], [], []>} : vector<64x48xf32>, vector<48x32xf32>, vector<64x32xf32> -> vector<64x32xf32>
    %23 = vector.broadcast %6 : vector<1x32xf32> to vector<64x32xf32>
    %24 = arith.addf %22, %23 : vector<64x32xf32>
    %cst_24 = arith.constant dense<0.000000e+00> : vector<64xf32>
    %25 = vector.multi_reduction <add>, %24, %cst_24 [1] : vector<64x32xf32> to vector<64xf32>
    %26 = vector.shape_cast %25 : vector<64xf32> to vector<64x1xf32>
    %cst_25 = arith.constant 3.200000e+01 : f32
    %27 = vector.broadcast %cst_25 : f32 to vector<64x1xf32>
    %28 = arith.divf %26, %27 : vector<64x1xf32>
    %29 = vector.broadcast %28 : vector<64x1xf32> to vector<64x32xf32>
    %30 = arith.subf %24, %29 : vector<64x32xf32>
    %31 = arith.mulf %30, %30 : vector<64x32xf32>
    %cst_26 = arith.constant dense<0.000000e+00> : vector<64xf32>
    %32 = vector.multi_reduction <add>, %31, %cst_26 [1] : vector<64x32xf32> to vector<64xf32>
    %33 = vector.shape_cast %32 : vector<64xf32> to vector<64x1xf32>
    %cst_27 = arith.constant 3.200000e+01 : f32
    %34 = vector.broadcast %cst_27 : f32 to vector<64x1xf32>
    %35 = arith.divf %33, %34 : vector<64x1xf32>
    %36 = vector.broadcast %28 : vector<64x1xf32> to vector<64x32xf32>
    %37 = arith.subf %24, %36 : vector<64x32xf32>
    %cst_28 = arith.constant 9.99999974E-6 : f32
    %38 = vector.broadcast %cst_28 : f32 to vector<64x1xf32>
    %39 = arith.addf %35, %38 : vector<64x1xf32>
    %40 = math.rsqrt %39 : vector<64x1xf32>
    %41 = vector.broadcast %40 : vector<64x1xf32> to vector<64x32xf32>
    %42 = arith.mulf %37, %41 : vector<64x32xf32>
    %43 = vector.broadcast %7 : vector<1x32xf32> to vector<64x32xf32>
    %44 = arith.mulf %42, %43 : vector<64x32xf32>
    %45 = vector.broadcast %8 : vector<1x32xf32> to vector<64x32xf32>
    %46 = arith.addf %44, %45 : vector<64x32xf32>
    %cst_29 = arith.constant dense<0.000000e+00> : vector<64xf32>
    %47 = vector.multi_reduction <add>, %46, %cst_29 [1] : vector<64x32xf32> to vector<64xf32>
    %48 = vector.shape_cast %47 : vector<64xf32> to vector<64x1xf32>
    %cst_30 = arith.constant 3.200000e+01 : f32
    %49 = vector.broadcast %cst_30 : f32 to vector<64x1xf32>
    %50 = arith.divf %48, %49 : vector<64x1xf32>
    %51 = vector.broadcast %50 : vector<64x1xf32> to vector<64x32xf32>
    %52 = arith.subf %46, %51 : vector<64x32xf32>
    %53 = arith.mulf %52, %52 : vector<64x32xf32>
    %cst_31 = arith.constant dense<0.000000e+00> : vector<64xf32>
    %54 = vector.multi_reduction <add>, %53, %cst_31 [1] : vector<64x32xf32> to vector<64xf32>
    %55 = vector.shape_cast %54 : vector<64xf32> to vector<64x1xf32>
    %cst_32 = arith.constant 3.200000e+01 : f32
    %56 = vector.broadcast %cst_32 : f32 to vector<64x1xf32>
    %57 = arith.divf %55, %56 : vector<64x1xf32>
    %58 = vector.broadcast %50 : vector<64x1xf32> to vector<64x32xf32>
    %59 = arith.subf %46, %58 : vector<64x32xf32>
    %cst_33 = arith.constant 9.99999974E-6 : f32
    %60 = vector.broadcast %cst_33 : f32 to vector<64x1xf32>
    %61 = arith.addf %57, %60 : vector<64x1xf32>
    %62 = math.rsqrt %61 : vector<64x1xf32>
    %63 = vector.broadcast %62 : vector<64x1xf32> to vector<64x32xf32>
    %64 = arith.mulf %59, %63 : vector<64x32xf32>
    %65 = vector.broadcast %11 : vector<1x32xf32> to vector<64x32xf32>
    %66 = arith.mulf %64, %65 : vector<64x32xf32>
    %67 = vector.broadcast %12 : vector<1x32xf32> to vector<64x32xf32>
    %68 = arith.addf %66, %67 : vector<64x32xf32>
    %cst_34 = arith.constant dense<0.000000e+00> : vector<64x96xf32>
    %69 = tpu.matmul %68, %1, %cst_34 {dimension_numbers = #tpu.dot_dimension_numbers<[1], [0], [0], [1], [0, 0, 1, 1], [], []>} : vector<64x32xf32>, vector<32x96xf32>, vector<64x96xf32> -> vector<64x96xf32>
    %70 = vector.broadcast %9 : vector<1x96xf32> to vector<64x96xf32>
    %71 = arith.addf %69, %70 : vector<64x96xf32>
    %72 = vector.extract_strided_slice %71 {offsets = [0, 0], sizes = [64, 16], strides = [1, 1]} : vector<64x96xf32> to vector<64x16xf32>
    %73 = vector.shape_cast %72 : vector<64x16xf32> to vector<4x16x16xf32>
    %74 = vector.extract_strided_slice %71 {offsets = [0, 32], sizes = [64, 16], strides = [1, 1]} : vector<64x96xf32> to vector<64x16xf32>
    %75 = vector.shape_cast %74 : vector<64x16xf32> to vector<4x16x16xf32>
    %76 = vector.extract_strided_slice %71 {offsets = [0, 64], sizes = [64, 16], strides = [1, 1]} : vector<64x96xf32> to vector<64x16xf32>
    %77 = vector.shape_cast %76 : vector<64x16xf32> to vector<4x16x16xf32>
    "tpu.trace_start"() <{level = 10 : i32, message = "tqd,tkd->tqk"}> : () -> ()
    %cst_35 = arith.constant dense<0.000000e+00> : vector<4x16x16xf32>
    %78 = tpu.matmul %73, %75, %cst_35 {dimension_numbers = #tpu.dot_dimension_numbers<[2], [2], [1], [1], [0, 0, 0, 1, 1, 1], [0], [0]>} : vector<4x16x16xf32>, vector<4x16x16xf32>, vector<4x16x16xf32> -> vector<4x16x16xf32>
    "tpu.trace_stop"() : () -> ()
    %cst_36 = arith.constant 2.500000e-01 : f32
    %79 = vector.broadcast %cst_36 : f32 to vector<4x16x16xf32>
    %80 = arith.mulf %78, %79 : vector<4x16x16xf32>
    %cst_37 = arith.constant dense<0xFF800000> : vector<4x16xf32>
    %81 = vector.multi_reduction <maximumf>, %80, %cst_37 [2] : vector<4x16x16xf32> to vector<4x16xf32>
    %82 = vector.shape_cast %81 : vector<4x16xf32> to vector<4x16x1xf32>
    %83 = vector.broadcast %82 : vector<4x16x1xf32> to vector<4x16x16xf32>
    %84 = arith.subf %80, %83 : vector<4x16x16xf32>
    %85 = math.exp %84 : vector<4x16x16xf32>
    %cst_38 = arith.constant dense<0.000000e+00> : vector<4x16xf32>
    %86 = vector.multi_reduction <add>, %85, %cst_38 [2] : vector<4x16x16xf32> to vector<4x16xf32>
    %87 = vector.shape_cast %86 : vector<4x16xf32> to vector<4x16x1xf32>
    %88 = tpu.reciprocal %87 {approx = true} : vector<4x16x1xf32> -> vector<4x16x1xf32>
    %89 = vector.broadcast %88 : vector<4x16x1xf32> to vector<4x16x16xf32>
    %90 = arith.mulf %85, %89 : vector<4x16x16xf32>
    "tpu.trace_start"() <{level = 10 : i32, message = "tqk,tkd->tqd"}> : () -> ()
    %cst_39 = arith.constant dense<0.000000e+00> : vector<4x16x16xf32>
    %91 = tpu.matmul %90, %77, %cst_39 {dimension_numbers = #tpu.dot_dimension_numbers<[2], [1], [1], [2], [0, 0, 0, 1, 1, 2], [0], [0]>} : vector<4x16x16xf32>, vector<4x16x16xf32>, vector<4x16x16xf32> -> vector<4x16x16xf32>
    "tpu.trace_stop"() : () -> ()
    %92 = vector.shape_cast %91 : vector<4x16x16xf32> to vector<64x16xf32>
    %93 = vector.extract_strided_slice %71 {offsets = [0, 16], sizes = [64, 16], strides = [1, 1]} : vector<64x96xf32> to vector<64x16xf32>
    %94 = vector.shape_cast %93 : vector<64x16xf32> to vector<4x16x16xf32>
    %95 = vector.extract_strided_slice %71 {offsets = [0, 48], sizes = [64, 16], strides = [1, 1]} : vector<64x96xf32> to vector<64x16xf32>
    %96 = vector.shape_cast %95 : vector<64x16xf32> to vector<4x16x16xf32>
    %97 = vector.extract_strided_slice %71 {offsets = [0, 80], sizes = [64, 16], strides = [1, 1]} : vector<64x96xf32> to vector<64x16xf32>
    %98 = vector.shape_cast %97 : vector<64x16xf32> to vector<4x16x16xf32>
    "tpu.trace_start"() <{level = 10 : i32, message = "tqd,tkd->tqk"}> : () -> ()
    %cst_40 = arith.constant dense<0.000000e+00> : vector<4x16x16xf32>
    %99 = tpu.matmul %94, %96, %cst_40 {dimension_numbers = #tpu.dot_dimension_numbers<[2], [2], [1], [1], [0, 0, 0, 1, 1, 1], [0], [0]>} : vector<4x16x16xf32>, vector<4x16x16xf32>, vector<4x16x16xf32> -> vector<4x16x16xf32>
    "tpu.trace_stop"() : () -> ()
    %cst_41 = arith.constant 2.500000e-01 : f32
    %100 = vector.broadcast %cst_41 : f32 to vector<4x16x16xf32>
    %101 = arith.mulf %99, %100 : vector<4x16x16xf32>
    %cst_42 = arith.constant dense<0xFF800000> : vector<4x16xf32>
    %102 = vector.multi_reduction <maximumf>, %101, %cst_42 [2] : vector<4x16x16xf32> to vector<4x16xf32>
    %103 = vector.shape_cast %102 : vector<4x16xf32> to vector<4x16x1xf32>
    %104 = vector.broadcast %103 : vector<4x16x1xf32> to vector<4x16x16xf32>
    %105 = arith.subf %101, %104 : vector<4x16x16xf32>
    %106 = math.exp %105 : vector<4x16x16xf32>
    %cst_43 = arith.constant dense<0.000000e+00> : vector<4x16xf32>
    %107 = vector.multi_reduction <add>, %106, %cst_43 [2] : vector<4x16x16xf32> to vector<4x16xf32>
    %108 = vector.shape_cast %107 : vector<4x16xf32> to vector<4x16x1xf32>
    %109 = tpu.reciprocal %108 {approx = true} : vector<4x16x1xf32> -> vector<4x16x1xf32>
    %110 = vector.broadcast %109 : vector<4x16x1xf32> to vector<4x16x16xf32>
    %111 = arith.mulf %106, %110 : vector<4x16x16xf32>
    "tpu.trace_start"() <{level = 10 : i32, message = "tqk,tkd->tqd"}> : () -> ()
    %cst_44 = arith.constant dense<0.000000e+00> : vector<4x16x16xf32>
    %112 = tpu.matmul %111, %98, %cst_44 {dimension_numbers = #tpu.dot_dimension_numbers<[2], [1], [1], [2], [0, 0, 0, 1, 1, 2], [0], [0]>} : vector<4x16x16xf32>, vector<4x16x16xf32>, vector<4x16x16xf32> -> vector<4x16x16xf32>
    "tpu.trace_stop"() : () -> ()
    %113 = vector.shape_cast %112 : vector<4x16x16xf32> to vector<64x16xf32>
    %114 = tpu.concatenate %92, %113 in 1 : vector<64x16xf32>, vector<64x16xf32> -> vector<64x32xf32>
    %cst_45 = arith.constant dense<0.000000e+00> : vector<64x32xf32>
    %115 = tpu.matmul %114, %2, %cst_45 {dimension_numbers = #tpu.dot_dimension_numbers<[1], [0], [0], [1], [0, 0, 1, 1], [], []>} : vector<64x32xf32>, vector<32x32xf32>, vector<64x32xf32> -> vector<64x32xf32>
    %116 = vector.broadcast %10 : vector<1x32xf32> to vector<64x32xf32>
    %117 = arith.addf %115, %116 : vector<64x32xf32>
    %118 = arith.addf %46, %117 : vector<64x32xf32>
    %cst_46 = arith.constant dense<0.000000e+00> : vector<64xf32>
    %119 = vector.multi_reduction <add>, %118, %cst_46 [1] : vector<64x32xf32> to vector<64xf32>
    %120 = vector.shape_cast %119 : vector<64xf32> to vector<64x1xf32>
    %cst_47 = arith.constant 3.200000e+01 : f32
    %121 = vector.broadcast %cst_47 : f32 to vector<64x1xf32>
    %122 = arith.divf %120, %121 : vector<64x1xf32>
    %123 = vector.broadcast %122 : vector<64x1xf32> to vector<64x32xf32>
    %124 = arith.subf %118, %123 : vector<64x32xf32>
    %125 = arith.mulf %124, %124 : vector<64x32xf32>
    %cst_48 = arith.constant dense<0.000000e+00> : vector<64xf32>
    %126 = vector.multi_reduction <add>, %125, %cst_48 [1] : vector<64x32xf32> to vector<64xf32>
    %127 = vector.shape_cast %126 : vector<64xf32> to vector<64x1xf32>
    %cst_49 = arith.constant 3.200000e+01 : f32
    %128 = vector.broadcast %cst_49 : f32 to vector<64x1xf32>
    %129 = arith.divf %127, %128 : vector<64x1xf32>
    %130 = vector.broadcast %122 : vector<64x1xf32> to vector<64x32xf32>
    %131 = arith.subf %118, %130 : vector<64x32xf32>
    %cst_50 = arith.constant 9.99999974E-6 : f32
    %132 = vector.broadcast %cst_50 : f32 to vector<64x1xf32>
    %133 = arith.addf %129, %132 : vector<64x1xf32>
    %134 = math.rsqrt %133 : vector<64x1xf32>
    %135 = vector.broadcast %134 : vector<64x1xf32> to vector<64x32xf32>
    %136 = arith.mulf %131, %135 : vector<64x32xf32>
    %137 = vector.broadcast %15 : vector<1x32xf32> to vector<64x32xf32>
    %138 = arith.mulf %136, %137 : vector<64x32xf32>
    %139 = vector.broadcast %16 : vector<1x32xf32> to vector<64x32xf32>
    %140 = arith.addf %138, %139 : vector<64x32xf32>
    %cst_51 = arith.constant dense<0.000000e+00> : vector<64x128xf32>
    %141 = tpu.matmul %140, %3, %cst_51 {dimension_numbers = #tpu.dot_dimension_numbers<[1], [0], [0], [1], [0, 0, 1, 1], [], []>} : vector<64x32xf32>, vector<32x128xf32>, vector<64x128xf32> -> vector<64x128xf32>
    %142 = vector.broadcast %13 : vector<1x128xf32> to vector<64x128xf32>
    %143 = arith.addf %141, %142 : vector<64x128xf32>
    %144 = arith.mulf %143, %143 : vector<64x128xf32>
    %145 = arith.mulf %143, %144 : vector<64x128xf32>
    %cst_52 = arith.constant 4.471500e-02 : f32
    %146 = vector.broadcast %cst_52 : f32 to vector<64x128xf32>
    %147 = arith.mulf %146, %145 : vector<64x128xf32>
    %148 = arith.addf %143, %147 : vector<64x128xf32>
    %cst_53 = arith.constant 0.797884583 : f32
    %149 = vector.broadcast %cst_53 : f32 to vector<64x128xf32>
    %150 = arith.mulf %149, %148 : vector<64x128xf32>
    %151 = math.tanh %150 : vector<64x128xf32>
    %cst_54 = arith.constant 1.000000e+00 : f32
    %152 = vector.broadcast %cst_54 : f32 to vector<64x128xf32>
    %153 = arith.addf %152, %151 : vector<64x128xf32>
    %cst_55 = arith.constant 5.000000e-01 : f32
    %154 = vector.broadcast %cst_55 : f32 to vector<64x128xf32>
    %155 = arith.mulf %154, %153 : vector<64x128xf32>
    %156 = arith.mulf %143, %155 : vector<64x128xf32>
    %cst_56 = arith.constant dense<0.000000e+00> : vector<64x32xf32>
    %157 = tpu.matmul %156, %4, %cst_56 {dimension_numbers = #tpu.dot_dimension_numbers<[1], [0], [0], [1], [0, 0, 1, 1], [], []>} : vector<64x128xf32>, vector<128x32xf32>, vector<64x32xf32> -> vector<64x32xf32>
    %158 = vector.broadcast %14 : vector<1x32xf32> to vector<64x32xf32>
    %159 = arith.addf %157, %158 : vector<64x32xf32>
    %160 = arith.addf %118, %159 : vector<64x32xf32>
    %cst_57 = arith.constant dense<0.000000e+00> : vector<64xf32>
    %161 = vector.multi_reduction <add>, %160, %cst_57 [1] : vector<64x32xf32> to vector<64xf32>
    %162 = vector.shape_cast %161 : vector<64xf32> to vector<64x1xf32>
    %cst_58 = arith.constant 3.200000e+01 : f32
    %163 = vector.broadcast %cst_58 : f32 to vector<64x1xf32>
    %164 = arith.divf %162, %163 : vector<64x1xf32>
    %165 = vector.broadcast %164 : vector<64x1xf32> to vector<64x32xf32>
    %166 = arith.subf %160, %165 : vector<64x32xf32>
    %167 = arith.mulf %166, %166 : vector<64x32xf32>
    %cst_59 = arith.constant dense<0.000000e+00> : vector<64xf32>
    %168 = vector.multi_reduction <add>, %167, %cst_59 [1] : vector<64x32xf32> to vector<64xf32>
    %169 = vector.shape_cast %168 : vector<64xf32> to vector<64x1xf32>
    %cst_60 = arith.constant 3.200000e+01 : f32
    %170 = vector.broadcast %cst_60 : f32 to vector<64x1xf32>
    %171 = arith.divf %169, %170 : vector<64x1xf32>
    %172 = vector.broadcast %164 : vector<64x1xf32> to vector<64x32xf32>
    %173 = arith.subf %160, %172 : vector<64x32xf32>
    %cst_61 = arith.constant 9.99999974E-6 : f32
    %174 = vector.broadcast %cst_61 : f32 to vector<64x1xf32>
    %175 = arith.addf %171, %174 : vector<64x1xf32>
    %176 = math.rsqrt %175 : vector<64x1xf32>
    %177 = vector.broadcast %176 : vector<64x1xf32> to vector<64x32xf32>
    %178 = arith.mulf %173, %177 : vector<64x32xf32>
    %179 = vector.broadcast %17 : vector<1x32xf32> to vector<64x32xf32>
    %180 = arith.mulf %178, %179 : vector<64x32xf32>
    %181 = vector.broadcast %18 : vector<1x32xf32> to vector<64x32xf32>
    %182 = arith.addf %180, %181 : vector<64x32xf32>
    %183 = vector.shape_cast %182 : vector<64x32xf32> to vector<4x16x32xf32>
    %cst_62 = arith.constant dense<0.000000e+00> : vector<4x32xf32>
    %184 = vector.multi_reduction <add>, %183, %cst_62 [1] : vector<4x16x32xf32> to vector<4x32xf32>
    %cst_63 = arith.constant 1.600000e+01 : f32
    %185 = vector.broadcast %cst_63 : f32 to vector<4x32xf32>
    %186 = arith.divf %184, %185 : vector<4x32xf32>
    %cst_64 = arith.constant dense<0.000000e+00> : vector<4x2xf32>
    %187 = tpu.matmul %186, %5, %cst_64 {dimension_numbers = #tpu.dot_dimension_numbers<[1], [0], [0], [1], [0, 0, 1, 1], [], []>} : vector<4x32xf32>, vector<32x2xf32>, vector<4x2xf32> -> vector<4x2xf32>
    %188 = vector.broadcast %19 : vector<1x2xf32> to vector<4x2xf32>
    %189 = arith.addf %187, %188 : vector<4x2xf32>
    %cst_65 = arith.constant dense<0.000000e+00> : vector<2xf32>
    %190 = vector.multi_reduction <add>, %189, %cst_65 [0] : vector<4x2xf32> to vector<2xf32>
    %191 = vector.shape_cast %190 : vector<2xf32> to vector<1x2xf32>
    %cst_66 = arith.constant 4.000000e+00 : f32
    %192 = vector.broadcast %cst_66 : f32 to vector<1x2xf32>
    %193 = arith.divf %191, %192 : vector<1x2xf32>
    %194 = vector.shape_cast %193 : vector<1x2xf32> to vector<1x1x2xf32>
    %c0_67 = arith.constant 0 : index
    %c0_68 = arith.constant 0 : index
    %c0_69 = arith.constant 0 : index
    %195 = vector.load %arg4[%c0_67, %c0_68, %c0_69] : memref<1x1x2xf32, #tpu.memory_space<vmem>>, vector<1x1x2xf32>
    tpu.vector_store %arg4[%c0_67, %c0_68, %c0_69], %194 {strides = array<i32>} : memref<1x1x2xf32, #tpu.memory_space<vmem>>, vector<1x1x2xf32>,
    return
  }
  func.func @transform_0(%arg0: i32) -> (i32, i32, i32) {
    %c0_i32 = arith.constant 0 : i32
    %c0_i32_0 = arith.constant 0 : i32
    %c0_i32_1 = arith.constant 0 : i32
    return %arg0, %c0_i32, %c0_i32_0 : i32, i32, i32
  }
  func.func @transform_1(%arg0: i32) -> (i32, i32) {
    %c0_i32 = arith.constant 0 : i32
    %c0_i32_0 = arith.constant 0 : i32
    %c0_i32_1 = arith.constant 0 : i32
    return %c0_i32, %c0_i32_0 : i32, i32
  }
  func.func @transform_2(%arg0: i32) -> (i32, i32) {
    %c0_i32 = arith.constant 0 : i32
    %c0_i32_0 = arith.constant 0 : i32
    %c0_i32_1 = arith.constant 0 : i32
    return %c0_i32, %c0_i32_0 : i32, i32
  }
  func.func @transform_3(%arg0: i32) -> (i32, i32, i32) {
    %c0_i32 = arith.constant 0 : i32
    %c0_i32_0 = arith.constant 0 : i32
    %c0_i32_1 = arith.constant 0 : i32
    return %arg0, %c0_i32, %c0_i32_0 : i32, i32, i32
  }
}

</mosaic_0001>

<bundles_post_ra>
// kernel: tpu_custom_call.1
= control target key start
LH: loop header
LB: loop body
LE: loop exit
PB: predicated region body
PF: predicated region fallthrough
CT: control target
= control target key end

     0   :  { %8 = vsyncpa [#allocation3], 0  ;;  %s5014_s0 = inlined_call_operand.vmem [shape: f32[2,64,48], index: 0, kind: input, shape index: {}]   ;;  %s5015_s1 = inlined_call_operand.hbm [shape: f32[304,128], index: 1, kind: input, shape index: {}]   ;;  %s5016_s2 = inlined_call_operand.vmem [shape: f32[16,128], index: 2, kind: input, shape index: {}]   ;;  %s5017_s3 = inlined_call_operand.hbm [shape: f32[2,1,2], index: 3, kind: output, shape index: {}]  }
   0x1   :  { %9 = vsyncpa [#allocation4], 0 }
   0x2   :  { %11 = vsyncpa [#allocation4 + $0x1], 0  ;;  %s4184_s12 = smov 0   ;;  %s4186_s13 = smov 0  }
   0x3   :  { %s4188_s14 = smov 0   ;;  %s4190_s15 = smov 0  }
   0x4 LB: > { %s4205_s16 = sadd.s32 4294967295, %s4150_s15   ;;  %s3355_s17 = sadd.s32 4294967294, %s4150_s15   ;;  %s4150_s15 = sphi %s4190_s15, %s5025_s15   ;;  %s4146_s14 = sphi %s4188_s14, %s5024_s14   ;;  %s4142_s13 = sphi %s4186_s13, %s5023_s13   ;;  %s4138_s12 = sphi %s4184_s12, %s5022_s12  }
   0x5   : > { %s4209_s18 = sadd.s32 1, %s4150_s15   ;;  %s92_s19 = sadd.s32 1, %s4146_s14 }
   0x6   : > { %s89_s20 = ssub.s32 %s4150_s15, %s4209_s18  ;;  %p102_p0 = scmp.ne.s32.totalorder %s4146_s14, %s4142_s13 }
   0x7   : > { %p90_p1 = scmp.eq.s32.totalorder %s89_s20, 0  ;;  %p103_p2 = scmp.eq.s32.totalorder %s4205_s16, 1 }
   0x8   : > { %p108_p3 = scmp.ne.s32.totalorder %s4142_s13, %s4138_s12  ;;  %p109_p4 = scmp.eq.s32.totalorder %s3355_s17, 1 }
   0x9   : > { %s4220_s21 = scalar_select %p90_p1, %s4146_s14, %s92_s19  }
   0xa   : > { %p4222_p5 = por %p103_p2, %p102_p0  ;;  %p4226_p6 = por %p109_p4, %p108_p3 }
   0xb   : > { %p3356_p7 = scmp.ge.s32.totalorder %s4150_s15, 1  ;;  %p116_p8 = scmp.lt.s32.totalorder %s4150_s15, 3 }
   0xc   : > { %s5019_s23 = scalar_select %p4226_p6, 1, 0 }
   0xd   : > { %p3870_p9 = scmp.eq.s32.totalorder %s4205_s16, 0  ;;  %p4233_p10 = pnand %p3356_p7, %p116_p8 }
   0xe   : > { %s4152_s25 = smov [#allocation2]  }
   0xf   : > { %s128_s26 = sshll.u32 %s4152_s25, 4  ;;  %p3862_p11 = pneg %p4233_p10  ;;  %s129_s26 = int_to_ptr.vmem [resolvable:$true] %s128_s26 }
  0x10   : > { %s4071_s27 = scalar_lea.vmem %s129_s26, 4864  ;;  %p4079_p3 = scmp.lt.s32.totalorder %s129_s26, %s129_s26 }
  0x11   : > { %p3863_p12 = pnand %p3870_p9, %p3862_p11  ;;  %p4072_p0 = scmp.ne.s32.totalorder %s129_s26, %s4071_s27 }
  0x12   : > { %p4080_p4 = scmp.lt.s32.totalorder %s4071_s27, %s4071_s27 }
  0x13   : > { %p4062_p13 = pneg %p3863_p12 }
  0x14   : > { %p4081_p6 = por %p4080_p4, %p4079_p3 }
  0x15   : > { %p4074_p1 = pnand %p4072_p0, %p4062_p13 }
  0x17   : > { %p4075_p2 = pneg %p4074_p1 }
  0x19   : > { %p4082_p7 = pnand %p4081_p6, %p4075_p2 }
  0x1b   : > { %4085 = shalt.err (!%p4082_p7)
}
  0x1c   : > { %s4153_s28 = smov 128   ;;  %s4154_s29 = smov 8  }
  0x1d   : > { %3865 = dma.hbm_to_vmem [thread:$0]  (!%p3863_p12), %s5015_s1, 4864, %s129_s26, [#allocation3], %s4153_s28, %s4153_s28, %s4154_s29  }
  0x1e   : > { %155 = sbr.rel (%p4233_p10) target bundleno = 4041 (0xfc9), region = 32 }
  0x23   : > { %4129 = dma.done.wait (%p3870_p9), [#allocation3], 4864  }
  0x24   : > { %4131 = vsyncadd (%p3870_p9), [#allocation3], 4294962432  ;;  %p178_p8 = scmp.lt.s32.totalorder %s4205_s16, 1  ;;  %v188_v0 = vld [vmem:[#allocation2 + $0x28] sm:$0xff]  ;;  %v187_v1 = vld [vmem:[#allocation2 + $0x20] sm:$0xff]  ;;  %vm247_vm0 = vcmask 392192  }
  0x25   : > { %3605 = vmatprep.subr.mxu0 %v188_v0  ;;  %v186_v2 = vld [vmem:[#allocation2 + $0x18] sm:$0xff]  ;;  %v185_v4 = vld [vmem:[#allocation2 + $0x10] sm:$0xff]  ;;  %v184_v5 = vld [vmem:[#allocation2 + $0x8] sm:$0xff]  ;;  %vm377_vm1 = vcmask 261120   ;;  %vm774_vm2 = vcmask 130048   ;;  %s4155_s4 = smov 96  }
  0x26   : > { %s179_s5 = scalar_select %p178_p8, %s4205_s16, 1  ;;  %3606 = vmatpush3.msra.mxu0 %v188_v0  ;;  %v183_v6 = vld [vmem:[#allocation2] sm:$0xff]  ;;  %vm4162_vm3 = vmmov 0   ;;  %vm3185_vm4 = vcmask 1041409   ;;  %vm3187_vm5 = vcmask 1042434   ;;  %vm3189_vm6 = vcmask 1043459  }
  0x27   : > { %3607 = vmatprep.subr.mxu0 %v187_v1  ;;  %v3363_v15 = vld [vmem:[%s5016_s2] ss:$0 sm:$0xff]  ;;  %s4158_s7 = smov 112   ;;  %s4159_s8 = smov 48   ;;  %vm3263_vm7 = vcmask 11264   ;;  %vm3273_vm8 = vcmask 8192  }
  0x28   : > { %s3461_s6 = sshll.u32 %s179_s5, 6  ;;  %3608 = vmatpush3.msra.mxu0 %v187_v1  ;;  %s4156_s5 = smov 64  }
  0x29   : > { %s4255_s9 = scalar_lea.vmem %s5014_s0, %s3461_s6  ;;  %3609 = vmatprep.subr.mxu0 %v186_v2  ;;  %s4157_s6 = smov 80  }
  0x2a   : > { %v235_v3 = vld [vmem:[%s4255_s9] sm:$0xff]  ;;  %3610 = vmatpush3.msra.mxu0 %v186_v2  ;;  %v236_v7 = vld [vmem:[%s4255_s9 + $0x8] sm:$0xff]  ;;  %v237_v8 = vld [vmem:[%s4255_s9 + $0x10] sm:$0xff]  ;;  %s4163_s26 = smov [#allocation5]  }
  0x2b   : > { %3617 = vmatprep.mubr.msk.f32.mxu0 %vm247_vm0, %v235_v3  ;;  %3611 = vmatprep.subr.mxu0 %v185_v4  ;;  %v238_v9 = vld [vmem:[%s4255_s9 + $0x18] sm:$0xff]  ;;  %v239_v10 = vld [vmem:[%s4255_s9 + $0x20] sm:$0xff]  ;;  %v240_v11 = vld [vmem:[%s4255_s9 + $0x28] sm:$0xff]  ;;  %s4090_s27 = sshll.u32 %s4163_s26, 4  ;;  %s4091_s27 = int_to_ptr.vmem [resolvable:$false] %s4090_s27 }
  0x2c   : > { %3612 = vmatpush3.msra.mxu0 %v185_v4  ;;  %v241_v12 = vld [vmem:[%s4255_s9 + $0x30] sm:$0xff]  ;;  %v242_v13 = vld [vmem:[%s4255_s9 + $0x38] sm:$0xff]  ;;  %s4160_s9 = smov 16  }
  0x2d   : > { %3613 = vmatprep.subr.mxu0 %v184_v5 }
  0x2e   : > { %3614 = vmatpush3.msra.mxu0 %v184_v5 }
  0x2f   : > { %3615 = vmatprep.subr.mxu0 %v183_v6 }
  0x30   : > { %3616 = vmatpush3.msra.mxu0 %v183_v6 }
  0x31   : > { %3618 = vmatmul.mubr.msk.f32.vlgmr.msra.gmra.mxu0 %vm247_vm0, %v236_v7 }
  0x32   : > { %3620 = vmatprep.mubr.msk.f32.mxu0 %vm247_vm0, %v237_v8 }
  0x35   : > { %3621 = vmatmul.mubr.msk.f32.gmra.mxu0 %vm247_vm0, %v238_v9 }
  0x36   : > { %3623 = vmatprep.mubr.msk.f32.mxu0 %vm247_vm0, %v239_v10 }
  0x39   : > { %3624 = vmatmul.mubr.msk.f32.gmra.mxu0 %vm247_vm0, %v240_v11 }
  0x3a   : > { %3626 = vmatprep.mubr.msk.f32.mxu0 %vm247_vm0, %v241_v12 }
  0x3d   : > { %3627 = vmatmul.mubr.msk.f32.gmra.mxu0 %vm247_vm0, %v242_v13 }
  0xf1   : > { %v3619_v14 = vpop.f32.mrf.mxu0 }
  0xf2   : > { %v344_v19 = vadd.f32 %v3619_v14, %v3363_v15 }
  0xf3   : > { %v338_v16 = vpop.f32.mrf.mxu0 }
  0xf4   : > { %v339_v17 = vadd.f32 %v3363_v15, %v338_v16  ;;  %v381_v26 = vsel %vm377_vm1, %v344_v19, 0.0 }
  0xf5   : > { %v3622_v18 = vpop.f32.mrf.mxu0 }
  0xf6   : > { %v378_v20 = vsel %vm377_vm1, %v339_v17, 0.0  ;;  %v354_v24 = vadd.f32 %v3622_v18, %v3363_v15 }
  0xf7   : > { %v348_v21 = vpop.f32.mrf.mxu0  ;;  %379 = vadd.xlane.f32.xlu0 %v378_v20 }
  0xf8   : > { %v349_v22 = vadd.f32 %v3363_v15, %v348_v21  ;;  %v387_v31 = vsel %vm377_vm1, %v354_v24, 0.0 }
  0xf9   : > { %v3625_v23 = vpop.f32.mrf.mxu0 }
  0xfa   : > { %v384_v25 = vsel %vm377_vm1, %v349_v22, 0.0  ;;  %v364_v28 = vadd.f32 %v3625_v23, %v3363_v15 }
  0xfb   : > { %v358_v27 = vpop.f32.mrf.mxu0  ;;  %385 = vadd.xlane.f32.xlu1 %v384_v25  ;;  %382 = vadd.xlane.f32.xlu0 %v381_v26 }
  0xfc   : > { %v359_v29 = vadd.f32 %v3363_v15, %v358_v27  ;;  %v393_v36 = vsel %vm377_vm1, %v364_v28, 0.0 }
  0xfd   : > { %v3628_v30 = vpop.f32.mrf.mxu0 }
  0xfe   : > { %v390_v32 = vsel %vm377_vm1, %v359_v29, 0.0  ;;  %v374_v34 = vadd.f32 %v3628_v30, %v3363_v15 }
  0xff   : > { %v368_v33 = vpop.f32.mrf.mxu0  ;;  %388 = vadd.xlane.f32.xlu1 %v387_v31  ;;  %391 = vadd.xlane.f32.xlu0 %v390_v32 }
 0x100   : > { %v369_v35 = vadd.f32 %v3363_v15, %v368_v33  ;;  %v399_v38 = vsel %vm377_vm1, %v374_v34, 0.0 }
 0x102   : > { %v396_v37 = vsel %vm377_vm1, %v369_v35, 0.0 }
 0x103   : > { %394 = vadd.xlane.f32.xlu1 %v393_v36  ;;  %397 = vadd.xlane.f32.xlu0 %v396_v37 }
 0x107   : > { %400 = vadd.xlane.f32.xlu1 %v399_v38 }
 0x180   : > { %v380_v39 = vpop.xlane.xlu0 %379 }
 0x181   : > { %v403_v40 = vmul.f32 0.03125, %v380_v39  ;;  %v3372_v39 = vld [vmem:[%s5016_s2 + $0x1] ss:$0 sm:$0xff] }
 0x183   : > { %v4284_v41 = vsub.f32 %v339_v17, %v403_v40 }
 0x184   : > { %v386_v42 = vpop.xlane.xlu1 %385  ;;  %v383_v43 = vpop.xlane.xlu0 %382 }
 0x185   : > { %v405_v44 = vmul.f32 0.03125, %v386_v42  ;;  %v404_v45 = vmul.f32 0.03125, %v383_v43  ;;  %v419_v46 = vmul.f32 %v4284_v41, %v4284_v41  ;;  %v3373_v43 = vld [vmem:[%s5016_s2 + $0x2] ss:$0 sm:$0xff] }
 0x187   : > { %v4288_v47 = vsub.f32 %v349_v22, %v405_v44  ;;  %v4290_v48 = vsub.f32 %v344_v19, %v404_v45  ;;  %v427_v49 = vsel %vm377_vm1, %v419_v46, 0.0 }
 0x188   : > { %v389_v50 = vpop.xlane.xlu1 %388  ;;  %428 = vadd.xlane.f32.xlu0 %v427_v49  ;;  %v392_v51 = vpop.xlane.xlu0 %391 }
 0x189   : > { %v406_v52 = vmul.f32 0.03125, %v389_v50  ;;  %v407_v53 = vmul.f32 0.03125, %v392_v51  ;;  %v421_v54 = vmul.f32 %v4288_v47, %v4288_v47  ;;  %v420_v55 = vmul.f32 %v4290_v48, %v4290_v48 }
 0x18b   : > { %v4297_v56 = vsub.f32 %v354_v24, %v406_v52  ;;  %v4299_v57 = vsub.f32 %v359_v29, %v407_v53  ;;  %v433_v58 = vsel %vm377_vm1, %v421_v54, 0.0  ;;  %v430_v59 = vsel %vm377_vm1, %v420_v55, 0.0 }
 0x18c   : > { %v395_v60 = vpop.xlane.xlu1 %394  ;;  %434 = vadd.xlane.f32.xlu0 %v433_v58  ;;  %431 = vadd.xlane.f32.xlu1 %v430_v59  ;;  %v398_v61 = vpop.xlane.xlu0 %397 }
 0x18d   : > { %v408_v62 = vmul.f32 0.03125, %v395_v60  ;;  %v409_v63 = vmul.f32 0.03125, %v398_v61  ;;  %v422_v0 = vmul.f32 %v4297_v56, %v4297_v56  ;;  %v423_v1 = vmul.f32 %v4299_v57, %v4299_v57 }
 0x18f   : > { %v4307_v2 = vsub.f32 %v364_v28, %v408_v62  ;;  %v4309_v3 = vsub.f32 %v369_v35, %v409_v63  ;;  %v436_v4 = vsel %vm377_vm1, %v422_v0, 0.0  ;;  %v439_v5 = vsel %vm377_vm1, %v423_v1, 0.0 }
 0x190   : > { %v401_v6 = vpop.xlane.xlu1 %400  ;;  %437 = vadd.xlane.f32.xlu1 %v436_v4  ;;  %440 = vadd.xlane.f32.xlu0 %v439_v5 }
 0x191   : > { %v410_v7 = vmul.f32 0.03125, %v401_v6  ;;  %v424_v8 = vmul.f32 %v4307_v2, %v4307_v2  ;;  %v425_v9 = vmul.f32 %v4309_v3, %v4309_v3 }
 0x193   : > { %v4317_v10 = vsub.f32 %v374_v34, %v410_v7  ;;  %v442_v11 = vsel %vm377_vm1, %v424_v8, 0.0  ;;  %v445_v12 = vsel %vm377_vm1, %v425_v9, 0.0 }
 0x194   : > { %443 = vadd.xlane.f32.xlu1 %v442_v11  ;;  %446 = vadd.xlane.f32.xlu0 %v445_v12 }
 0x195   : > { %v426_v13 = vmul.f32 %v4317_v10, %v4317_v10 }
 0x197   : > { %v448_v14 = vsel %vm377_vm1, %v426_v13, 0.0 }
 0x198   : > { %449 = vadd.xlane.f32.xlu1 %v448_v14 }
 0x211   : > { %v429_v15 = vpop.xlane.xlu0 %428 }
 0x212   : > { %v451_v16 = vmul.f32 0.03125, %v429_v15 }
 0x214   : > { %v459_v17 = vadd.f32 1e-05, %v451_v16 }
 0x215   : > { %v432_v18 = vpop.xlane.xlu1 %431  ;;  %v435_v19 = vpop.xlane.xlu0 %434 }
 0x216   : > { %3916 = vrsqrt.f32 %v459_v17  ;;  %v452_v20 = vmul.f32 0.03125, %v432_v18  ;;  %v453_v21 = vmul.f32 0.03125, %v435_v19 }
 0x218   : > { %v460_v22 = vadd.f32 1e-05, %v452_v20  ;;  %v461_v23 = vadd.f32 1e-05, %v453_v21 }
 0x219   : > { %v438_v24 = vpop.xlane.xlu1 %437  ;;  %v441_v25 = vpop.xlane.xlu0 %440 }
 0x21a   : > { %3918 = vrsqrt.f32 %v460_v22  ;;  %v454_v26 = vmul.f32 0.03125, %v438_v24  ;;  %v455_v27 = vmul.f32 0.03125, %v441_v25 }
 0x21b   : > { %3920 = vrsqrt.f32 %v461_v23 }
 0x21c   : > { %v462_v28 = vadd.f32 1e-05, %v454_v26  ;;  %v463_v29 = vadd.f32 1e-05, %v455_v27 }
 0x21d   : > { %v444_v30 = vpop.xlane.xlu1 %443  ;;  %v447_v31 = vpop.xlane.xlu0 %446 }
 0x21e   : > { %3922 = vrsqrt.f32 %v462_v28  ;;  %v456_v32 = vmul.f32 0.03125, %v444_v30  ;;  %v457_v33 = vmul.f32 0.03125, %v447_v31 }
 0x21f   : > { %3924 = vrsqrt.f32 %v463_v29 }
 0x220   : > { %v464_v34 = vadd.f32 1e-05, %v456_v32  ;;  %v465_v35 = vadd.f32 1e-05, %v457_v33 }
 0x221   : > { %v450_v36 = vpop.xlane.xlu1 %449 }
 0x222   : > { %3926 = vrsqrt.f32 %v464_v34  ;;  %v458_v37 = vmul.f32 0.03125, %v450_v36 }
 0x223   : > { %v3917_v38 = vpop.eup %3916  ;;  %3928 = vrsqrt.f32 %v465_v35 }
 0x224   : > { %v466_v40 = vadd.f32 1e-05, %v458_v37  ;;  %v475_v42 = vmul.f32 %v3917_v38, %v4284_v41 }
 0x226   : > { %3930 = vrsqrt.f32 %v466_v40  ;;  %v487_v44 = vmul.f32 %v3372_v39, %v475_v42 }
 0x227   : > { %v3919_v45 = vpop.eup %3918 }
 0x228   : > { %v3921_v46 = vpop.eup %3920  ;;  %v4331_v49 = vadd.f32 %v3373_v43, %v487_v44  ;;  %v476_v50 = vmul.f32 %v3919_v45, %v4290_v48 }
 0x229   : > { %v477_v51 = vmul.f32 %v3921_v46, %v4288_v47 }
 0x22a   : > { %v507_v52 = vsel %vm377_vm1, %v4331_v49, 0.0  ;;  %v488_v53 = vmul.f32 %v3372_v39, %v476_v50 }
 0x22b   : > { %v3923_v54 = vpop.eup %3922  ;;  %508 = vadd.xlane.f32.xlu0 %v507_v52  ;;  %v489_v41 = vmul.f32 %v3372_v39, %v477_v51 }
 0x22c   : > { %v3925_v55 = vpop.eup %3924  ;;  %v4337_v58 = vadd.f32 %v3373_v43, %v488_v53  ;;  %v478_v59 = vmul.f32 %v3923_v54, %v4297_v56 }
 0x22d   : > { %v4340_v60 = vadd.f32 %v3373_v43, %v489_v41  ;;  %v479_v61 = vmul.f32 %v3925_v55, %v4299_v57 }
 0x22e   : > { %v510_v48 = vsel %vm377_vm1, %v4337_v58, 0.0  ;;  %v490_v47 = vmul.f32 %v3372_v39, %v478_v59 }
 0x22f   : > { %v3927_v62 = vpop.eup %3926  ;;  %511 = vadd.xlane.f32.xlu1 %v510_v48  ;;  %v513_v63 = vsel %vm377_vm1, %v4340_v60, 0.0  ;;  %v491_v0 = vmul.f32 %v3372_v39, %v479_v61 }
 0x230   : > { %v3929_v1 = vpop.eup %3928  ;;  %514 = vadd.xlane.f32.xlu0 %v513_v63  ;;  %v4347_v4 = vadd.f32 %v3373_v43, %v490_v47  ;;  %v480_v56 = vmul.f32 %v3927_v62, %v4307_v2  ;;  %v192_v62 = vld [vmem:[#allocation2 + $0x48] sm:$0xff]  ;;  %v191_v63 = vld [vmem:[#allocation2 + $0x40] sm:$0xff] }
 0x231   : > { %v4350_v5 = vadd.f32 %v3373_v43, %v491_v0  ;;  %v481_v57 = vmul.f32 %v3929_v1, %v4309_v3  ;;  %3629 = vmatprep.subr.mxu0 %v192_v62  ;;  %v190_v0 = vld [vmem:[#allocation2 + $0x38] sm:$0xff]  ;;  %v189_v1 = vld [vmem:[#allocation2 + $0x30] sm:$0xff] }
 0x232   : > { %v516_v6 = vsel %vm377_vm1, %v4347_v4, 0.0  ;;  %v492_v7 = vmul.f32 %v3372_v39, %v480_v56  ;;  %3630 = vmatpush3.msra.mxu0 %v192_v62 }
 0x233   : > { %v3931_v8 = vpop.eup %3930  ;;  %517 = vadd.xlane.f32.xlu1 %v516_v6  ;;  %v519_v9 = vsel %vm377_vm1, %v4350_v5, 0.0  ;;  %v493_v11 = vmul.f32 %v3372_v39, %v481_v57  ;;  %3631 = vmatprep.subr.mxu0 %v191_v63 }
 0x234   : > { %520 = vadd.xlane.f32.xlu0 %v519_v9  ;;  %v4357_v12 = vadd.f32 %v3373_v43, %v492_v7  ;;  %v482_v13 = vmul.f32 %v3931_v8, %v4317_v10  ;;  %3632 = vmatpush3.msra.mxu0 %v191_v63 }
 0x235   : > { %v4360_v2 = vadd.f32 %v3373_v43, %v493_v11  ;;  %3633 = vmatprep.subr.mxu0 %v190_v0 }
 0x236   : > { %v522_v3 = vsel %vm377_vm1, %v4357_v12, 0.0  ;;  %v494_v14 = vmul.f32 %v3372_v39, %v482_v13  ;;  %3634 = vmatpush3.msra.mxu0 %v190_v0 }
 0x237   : > { %523 = vadd.xlane.f32.xlu1 %v522_v3  ;;  %v525_v15 = vsel %vm377_vm1, %v4360_v2, 0.0  ;;  %3635 = vmatprep.subr.mxu0 %v189_v1 }
 0x238   : > { %526 = vadd.xlane.f32.xlu0 %v525_v15  ;;  %v4366_v16 = vadd.f32 %v3373_v43, %v494_v14  ;;  %3636 = vmatpush3.msra.mxu0 %v189_v1 }
 0x23a   : > { %v528_v17 = vsel %vm377_vm1, %v4366_v16, 0.0 }
 0x23b   : > { %529 = vadd.xlane.f32.xlu1 %v528_v17 }
 0x2b4   : > { %v509_v18 = vpop.xlane.xlu0 %508 }
 0x2b5   : > { %v531_v19 = vmul.f32 0.03125, %v509_v18 }
 0x2b7   : > { %v4371_v10 = vsub.f32 %v4331_v49, %v531_v19 }
 0x2b8   : > { %v512_v20 = vpop.xlane.xlu1 %511 }
 0x2b9   : > { %v532_v21 = vmul.f32 0.03125, %v512_v20  ;;  %v515_v22 = vpop.xlane.xlu0 %514  ;;  %v547_v23 = vmul.f32 %v4371_v10, %v4371_v10 }
 0x2ba   : > { %v533_v24 = vmul.f32 0.03125, %v515_v22 }
 0x2bb   : > { %v4376_v25 = vsub.f32 %v4337_v58, %v532_v21  ;;  %v555_v26 = vsel %vm377_vm1, %v547_v23, 0.0 }
 0x2bc   : > { %v4380_v27 = vsub.f32 %v4340_v60, %v533_v24  ;;  %v518_v28 = vpop.xlane.xlu1 %517  ;;  %556 = vadd.xlane.f32.xlu0 %v555_v26 }
 0x2bd   : > { %v534_v29 = vmul.f32 0.03125, %v518_v28  ;;  %v521_v30 = vpop.xlane.xlu0 %520  ;;  %v548_v31 = vmul.f32 %v4376_v25, %v4376_v25 }
 0x2be   : > { %v535_v32 = vmul.f32 0.03125, %v521_v30  ;;  %v549_v33 = vmul.f32 %v4380_v27, %v4380_v27 }
 0x2bf   : > { %v4387_v34 = vsub.f32 %v4347_v4, %v534_v29  ;;  %v558_v35 = vsel %vm377_vm1, %v548_v31, 0.0 }
 0x2c0   : > { %v4391_v36 = vsub.f32 %v4350_v5, %v535_v32  ;;  %559 = vadd.xlane.f32.xlu1 %v558_v35  ;;  %v524_v37 = vpop.xlane.xlu1 %523  ;;  %v561_v38 = vsel %vm377_vm1, %v549_v33, 0.0  ;;  %v3374_v32 = vld [vmem:[%s5016_s2 + $0x5] ss:$0 sm:$0xff] }
 0x2c1   : > { %v536_v39 = vmul.f32 0.03125, %v524_v37  ;;  %562 = vadd.xlane.f32.xlu0 %v561_v38  ;;  %v527_v40 = vpop.xlane.xlu0 %526  ;;  %v550_v42 = vmul.f32 %v4387_v34, %v4387_v34  ;;  %v3375_v37 = vld [vmem:[%s5016_s2 + $0x6] ss:$0 sm:$0xff] }
 0x2c2   : > { %v537_v43 = vmul.f32 0.03125, %v527_v40  ;;  %v551_v44 = vmul.f32 %v4391_v36, %v4391_v36 }
 0x2c3   : > { %v4399_v45 = vsub.f32 %v4357_v12, %v536_v39  ;;  %v564_v46 = vsel %vm377_vm1, %v550_v42, 0.0 }
 0x2c4   : > { %v4403_v50 = vsub.f32 %v4360_v2, %v537_v43  ;;  %565 = vadd.xlane.f32.xlu1 %v564_v46  ;;  %v530_v51 = vpop.xlane.xlu1 %529  ;;  %v567_v52 = vsel %vm377_vm1, %v551_v44, 0.0 }
 0x2c5   : > { %v538_v53 = vmul.f32 0.03125, %v530_v51  ;;  %568 = vadd.xlane.f32.xlu0 %v567_v52  ;;  %v552_v54 = vmul.f32 %v4399_v45, %v4399_v45 }
 0x2c6   : > { %v553_v41 = vmul.f32 %v4403_v50, %v4403_v50 }
 0x2c7   : > { %v4411_v55 = vsub.f32 %v4366_v16, %v538_v53  ;;  %v570_v59 = vsel %vm377_vm1, %v552_v54, 0.0 }
 0x2c8   : > { %571 = vadd.xlane.f32.xlu1 %v570_v59  ;;  %v573_v61 = vsel %vm377_vm1, %v553_v41, 0.0 }
 0x2c9   : > { %574 = vadd.xlane.f32.xlu0 %v573_v61  ;;  %v554_v48 = vmul.f32 %v4411_v55, %v4411_v55 }
 0x2cb   : > { %v576_v47 = vsel %vm377_vm1, %v554_v48, 0.0 }
 0x2cc   : > { %577 = vadd.xlane.f32.xlu1 %v576_v47 }
 0x345   : > { %v557_v56 = vpop.xlane.xlu0 %556 }
 0x346   : > { %v579_v57 = vmul.f32 0.03125, %v557_v56 }
 0x348   : > { %v587_v6 = vadd.f32 1e-05, %v579_v57 }
 0x349   : > { %v560_v7 = vpop.xlane.xlu1 %559 }
 0x34a   : > { %3932 = vrsqrt.f32 %v587_v6  ;;  %v580_v8 = vmul.f32 0.03125, %v560_v7  ;;  %v563_v9 = vpop.xlane.xlu0 %562 }
 0x34b   : > { %v581_v11 = vmul.f32 0.03125, %v563_v9 }
 0x34c   : > { %v588_v13 = vadd.f32 1e-05, %v580_v8 }
 0x34d   : > { %v589_v3 = vadd.f32 1e-05, %v581_v11  ;;  %v566_v14 = vpop.xlane.xlu1 %565 }
 0x34e   : > { %3934 = vrsqrt.f32 %v588_v13  ;;  %v582_v15 = vmul.f32 0.03125, %v566_v14  ;;  %v569_v17 = vpop.xlane.xlu0 %568 }
 0x34f   : > { %3936 = vrsqrt.f32 %v589_v3  ;;  %v583_v18 = vmul.f32 0.03125, %v569_v17 }
 0x350   : > { %v590_v19 = vadd.f32 1e-05, %v582_v15 }
 0x351   : > { %v591_v20 = vadd.f32 1e-05, %v583_v18  ;;  %v572_v21 = vpop.xlane.xlu1 %571 }
 0x352   : > { %3938 = vrsqrt.f32 %v590_v19  ;;  %v584_v22 = vmul.f32 0.03125, %v572_v21  ;;  %v575_v23 = vpop.xlane.xlu0 %574 }
 0x353   : > { %3940 = vrsqrt.f32 %v591_v20  ;;  %v585_v24 = vmul.f32 0.03125, %v575_v23 }
 0x354   : > { %v592_v26 = vadd.f32 1e-05, %v584_v22 }
 0x355   : > { %v593_v28 = vadd.f32 1e-05, %v585_v24  ;;  %v578_v29 = vpop.xlane.xlu1 %577 }
 0x356   : > { %3942 = vrsqrt.f32 %v592_v26  ;;  %v586_v30 = vmul.f32 0.03125, %v578_v29 }
 0x357   : > { %v3933_v31 = vpop.eup %3932  ;;  %3944 = vrsqrt.f32 %v593_v28 }
 0x358   : > { %v594_v33 = vadd.f32 1e-05, %v586_v30  ;;  %v603_v35 = vmul.f32 %v3933_v31, %v4371_v10 }
 0x35a   : > { %3946 = vrsqrt.f32 %v594_v33  ;;  %v615_v38 = vmul.f32 %v3374_v32, %v603_v35 }
 0x35b   : > { %v3935_v39 = vpop.eup %3934 }
 0x35c   : > { %v3937_v40 = vpop.eup %3936  ;;  %v604_v42 = vmul.f32 %v3935_v39, %v4376_v25  ;;  %v627_v43 = vadd.f32 %v3375_v37, %v615_v38 }
 0x35d   : > { %v605_v44 = vmul.f32 %v3937_v40, %v4380_v27 }
 0x35e   : > { %v616_v46 = vmul.f32 %v3374_v32, %v604_v42  ;;  %3637 = vmatprep.mubr.msk.f32.mxu0 %vm377_vm1, %v627_v43 }
 0x35f   : > { %v3939_v51 = vpop.eup %3938  ;;  %v617_v52 = vmul.f32 %v3374_v32, %v605_v44 }
 0x360   : > { %v3941_v53 = vpop.eup %3940  ;;  %v628_v10 = vadd.f32 %v3375_v37, %v616_v46  ;;  %v606_v54 = vmul.f32 %v3939_v51, %v4387_v34 }
 0x361   : > { %v629_v41 = vadd.f32 %v3375_v37, %v617_v52  ;;  %v607_v59 = vmul.f32 %v3941_v53, %v4391_v36 }
 0x362   : > { %3638 = vmatmul.mubr.msk.f32.vlgmr.msra.gmra.mxu0 %vm377_vm1, %v628_v10  ;;  %v618_v61 = vmul.f32 %v3374_v32, %v606_v54 }
 0x363   : > { %v3943_v48 = vpop.eup %3942  ;;  %3640 = vmatprep.mubr.msk.f32.mxu0 %vm377_vm1, %v629_v41  ;;  %v619_v25 = vmul.f32 %v3374_v32, %v607_v59 }
 0x364   : > { %v3945_v27 = vpop.eup %3944  ;;  %v630_v47 = vadd.f32 %v3375_v37, %v618_v61  ;;  %v608_v62 = vmul.f32 %v3943_v48, %v4399_v45 }
 0x365   : > { %v631_v63 = vadd.f32 %v3375_v37, %v619_v25  ;;  %v609_v0 = vmul.f32 %v3945_v27, %v4403_v50  ;;  %v3376_v50 = vld [vmem:[%s5016_s2 + $0x3] ss:$0 sm:$0xff] }
 0x366   : > { %3641 = vmatmul.mubr.msk.f32.gmra.mxu0 %vm377_vm1, %v630_v47  ;;  %v620_v34 = vmul.f32 %v3374_v32, %v608_v62 }
 0x367   : > { %v3947_v1 = vpop.eup %3946  ;;  %3643 = vmatprep.mubr.msk.f32.mxu0 %vm377_vm1, %v631_v63  ;;  %v621_v36 = vmul.f32 %v3374_v32, %v609_v0 }
 0x368   : > { %v632_v56 = vadd.f32 %v3375_v37, %v620_v34  ;;  %v610_v57 = vmul.f32 %v3947_v1, %v4411_v55 }
 0x369   : > { %v633_v6 = vadd.f32 %v3375_v37, %v621_v36 }
 0x36a   : > { %3644 = vmatmul.mubr.msk.f32.gmra.mxu0 %vm377_vm1, %v632_v56  ;;  %v622_v7 = vmul.f32 %v3374_v32, %v610_v57 }
 0x36b   : > { %3646 = vmatprep.mubr.msk.f32.mxu0 %vm377_vm1, %v633_v6 }
 0x36c   : > { %v634_v45 = vadd.f32 %v3375_v37, %v622_v7 }
 0x36e   : > { %3647 = vmatmul.mubr.msk.f32.gmra.mxu0 %vm377_vm1, %v634_v45 }
 0x422   : > { %v3639_v8 = vpop.f32.mrf.mxu0 }
 0x423   : > { %v4443_v9 = vadd.f32 %v3639_v8, %v3376_v50 }
 0x424   : > { %v729_v11 = vpop.f32.mrf.mxu0 }
 0x425   : > { %v4445_v13 = vadd.f32 %v3376_v50, %v729_v11  ;;  %772 = vrot.lane.b32.xlu0 %v4443_v9, %s4155_s4 }
 0x426   : > { %v3642_v55 = vpop.f32.mrf.mxu0 }
 0x427   : > { %770 = vrot.lane.b32.xlu1 %v4445_v13, %s4155_s4  ;;  %3653 = vmatprep.mubr.msk.f32.mxu1 %vm774_vm2, %v4445_v13  ;;  %v4451_v14 = vadd.f32 %v3642_v55, %v3376_v50 }
 0x428   : > { %v739_v3 = vpop.f32.mrf.mxu0 }
 0x429   : > { %v4453_v15 = vadd.f32 %v3376_v50, %v739_v3 }
 0x42a   : > { %v3645_v17 = vpop.f32.mrf.mxu0 }
 0x42b   : > { %v4455_v18 = vadd.f32 %v3645_v17, %v3376_v50  ;;  %862 = vrot.lane.b32.xlu1 %v4451_v14, %s4155_s4  ;;  %3660 = vmatprep.mubr.msk.f32.mxu0 %vm774_vm2, %v4453_v15 }
 0x42c   : > { %v749_v19 = vpop.f32.mrf.mxu0 }
 0x42d   : > { %951 = vrot.lane.b32.xlu0 %v4455_v18, %s4155_s4  ;;  %v4464_v22 = vadd.f32 %v3376_v50, %v749_v19 }
 0x42e   : > { %v3648_v20 = vpop.f32.mrf.mxu0 }
 0x42f   : > { %v4461_v21 = vadd.f32 %v3648_v20, %v3376_v50  ;;  %860 = vrot.lane.b32.xlu1 %v4453_v15, %s4155_s4 }
 0x430   : > { %v759_v23 = vpop.f32.mrf.mxu0 }
 0x431   : > { %1040 = vrot.lane.b32.xlu0 %v4461_v21, %s4155_s4  ;;  %v4468_v24 = vadd.f32 %v3376_v50, %v759_v23 }
 0x433   : > { %949 = vrot.lane.b32.xlu1 %v4464_v22, %s4155_s4 }
 0x437   : > { %1038 = vrot.lane.b32.xlu1 %v4468_v24, %s4155_s4 }
 0x497   : > { %v773_v26 = vpop.permute.xlu0 %772 }
 0x498   : > { %3649 = vmatprep.subr.msk.mxu1 %vm774_vm2, %v773_v26 }
 0x499   : > { %v771_v28 = vpop.permute.xlu1 %770  ;;  %3650 = vmatpush3.xpose.msk.msra.mxu1 %vm774_vm2, %v773_v26 }
 0x49a   : > { %3651 = vmatprep.subr.msk.mxu1 %vm774_vm2, %v771_v28 }
 0x49d   : > { %v863_v29 = vpop.permute.xlu1 %862  ;;  %3652 = vmatpush3.xpose.msk.msra.mxu1 %vm774_vm2, %v771_v28 }
 0x49e   : > { %3656 = vmatprep.subr.msk.mxu0 %vm774_vm2, %v863_v29 }
 0x49f   : > { %3657 = vmatpush3.xpose.msk.msra.mxu0 %vm774_vm2, %v863_v29  ;;  %v952_v30 = vpop.permute.xlu0 %951 }
 0x4a0   : > { %3654 = vmatmul.mubr.msk.f32.vlgmr.msra.gmra.mxu1 %vm774_vm2, %v4443_v9  ;;  %3663 = vmatprep.subr.msk.mxu1 %vm774_vm2, %v952_v30 }
 0x4a1   : > { %v861_v31 = vpop.permute.xlu1 %860  ;;  %3664 = vmatpush3.xpose.msk.msra.mxu1 %vm774_vm2, %v952_v30  ;;  %3667 = vmatprep.mubr.msk.f32.mxu1 %vm774_vm2, %v4464_v22 }
 0x4a2   : > { %3658 = vmatprep.subr.msk.mxu0 %vm774_vm2, %v861_v31 }
 0x4a3   : > { %3659 = vmatpush3.xpose.msk.msra.mxu0 %vm774_vm2, %v861_v31  ;;  %v1041_v32 = vpop.permute.xlu0 %1040 }
 0x4a4   : > { %3670 = vmatprep.subr.msk.mxu0 %vm774_vm2, %v1041_v32 }
 0x4a5   : > { %v950_v33 = vpop.permute.xlu1 %949 }
 0x4a6   : > { %3661 = vmatmul.mubr.msk.f32.vlgmr.msra.gmra.mxu0 %vm774_vm2, %v4451_v14  ;;  %3665 = vmatprep.subr.msk.mxu1 %vm774_vm2, %v950_v33 }
 0x4a7   : > { %3666 = vmatpush3.xpose.msk.msra.mxu1 %vm774_vm2, %v950_v33  ;;  %3671 = vmatpush3.xpose.msk.msra.mxu0 %vm774_vm2, %v1041_v32 }
 0x4a8   : > { %3674 = vmatprep.mubr.msk.f32.mxu0 %vm774_vm2, %v4468_v24 }
 0x4a9   : > { %v1039_v35 = vpop.permute.xlu1 %1038 }
 0x4aa   : > { %3668 = vmatmul.mubr.msk.f32.vlgmr.msra.gmra.mxu1 %vm774_vm2, %v4455_v18  ;;  %3672 = vmatprep.subr.msk.mxu0 %vm774_vm2, %v1039_v35 }
 0x4ab   : > { %3673 = vmatpush3.xpose.msk.msra.mxu0 %vm774_vm2, %v1039_v35 }
 0x4ae   : > { %3675 = vmatmul.mubr.msk.f32.vlgmr.msra.gmra.mxu0 %vm774_vm2, %v4461_v21 }
 0x560   : > { %v3655_v37 = vpop.f32.mrf.mxu1 }
 0x561   : > { %v1126_v38 = vmul.f32 0.25, %v3655_v37 }
 0x562   : > { %v849_v39 = vpop.f32.mrf.mxu1 }
 0x563   : > { %v1125_v40 = vmul.f32 0.25, %v849_v39  ;;  %v1136_v42 = vsel %vm774_vm2, %v1126_v38, -inf }
 0x564   : > { %1137 = vmax.xlane.f32.xlu1 %v1136_v42 }
 0x565   : > { %v1133_v43 = vsel %vm774_vm2, %v1125_v40, -inf }
 0x566   : > { %v3662_v44 = vpop.f32.mrf.mxu0  ;;  %1134 = vmax.xlane.f32.xlu0 %v1133_v43 }
 0x567   : > { %v1128_v46 = vmul.f32 0.25, %v3662_v44 }
 0x568   : > { %v938_v51 = vpop.f32.mrf.mxu0 }
 0x569   : > { %v1127_v52 = vmul.f32 0.25, %v938_v51  ;;  %v1142_v53 = vsel %vm774_vm2, %v1128_v46, -inf }
 0x56a   : > { %1143 = vmax.xlane.f32.xlu0 %v1142_v53  ;;  %v3669_v10 = vpop.f32.mrf.mxu1 }
 0x56b   : > { %v1130_v54 = vmul.f32 0.25, %v3669_v10  ;;  %v1139_v61 = vsel %vm774_vm2, %v1127_v52, -inf }
 0x56c   : > { %v1027_v41 = vpop.f32.mrf.mxu1 }
 0x56d   : > { %v1129_v59 = vmul.f32 0.25, %v1027_v41  ;;  %v1148_v48 = vsel %vm774_vm2, %v1130_v54, -inf }
 0x56e   : > { %1140 = vmax.xlane.f32.xlu0 %v1139_v61  ;;  %1149 = vmax.xlane.f32.xlu1 %v1148_v48  ;;  %v3676_v25 = vpop.f32.mrf.mxu0 }
 0x56f   : > { %v1132_v27 = vmul.f32 0.25, %v3676_v25  ;;  %v1145_v63 = vsel %vm774_vm2, %v1129_v59, -inf }
 0x570   : > { %v1116_v47 = vpop.f32.mrf.mxu0 }
 0x571   : > { %v1131_v62 = vmul.f32 0.25, %v1116_v47  ;;  %v1154_v0 = vsel %vm774_vm2, %v1132_v27, -inf }
 0x572   : > { %1146 = vmax.xlane.f32.xlu0 %v1145_v63  ;;  %1155 = vmax.xlane.f32.xlu1 %v1154_v0 }
 0x573   : > { %v1151_v34 = vsel %vm774_vm2, %v1131_v62, -inf }
 0x576   : > { %1152 = vmax.xlane.f32.xlu0 %v1151_v34 }
 0x583   : > { %1221 = vrot.lane.b32.xlu1 %v4445_v13, %s4156_s5 }
 0x587   : > { %1310 = vrot.lane.b32.xlu1 %v4451_v14, %s4156_s5 }
 0x58b   : > { %1308 = vrot.lane.b32.xlu1 %v4453_v15, %s4156_s5 }
 0x58c   : > { %1223 = vrot.lane.b32.xlu0 %v4443_v9, %s4156_s5 }
 0x58f   : > { %1395 = vrot.lane.b32.xlu1 %v4464_v22, %s4156_s5 }
 0x590   : > { %1397 = vrot.lane.b32.xlu0 %v4455_v18, %s4156_s5 }
 0x593   : > { %1575 = vrot.lane.b32.xlu1 %v4443_v9, %s4157_s6 }
 0x594   : > { %1484 = vrot.lane.b32.xlu0 %v4461_v21, %s4156_s5 }
 0x597   : > { %1573 = vrot.lane.b32.xlu1 %v4445_v13, %s4157_s6 }
 0x598   : > { %1482 = vrot.lane.b32.xlu0 %v4468_v24, %s4156_s5 }
 0x59b   : > { %1569 = vrot.lane.b32.xlu1 %v4445_v13, %s4158_s7 }
 0x59c   : > { %1666 = vrot.lane.b32.xlu0 %v4451_v14, %s4157_s6 }
 0x59f   : > { %1664 = vrot.lane.b32.xlu1 %v4453_v15, %s4157_s6 }
 0x5a0   : > { %1571 = vrot.lane.b32.xlu0 %v4443_v9, %s4158_s7 }
 0x5a3   : > { %1660 = vrot.lane.b32.xlu1 %v4453_v15, %s4158_s7 }
 0x5a4   : > { %1757 = vrot.lane.b32.xlu0 %v4455_v18, %s4157_s6 }
 0x5ed   : > { %v1138_v1 = vpop.xlane.xlu1 %1137 }
 0x5ee   : > { %v1158_v36 = vsub.f32 %v1126_v38, %v1138_v1 }
 0x5ef   : > { %v1135_v56 = vpop.xlane.xlu0 %1134 }
 0x5f0   : > { %v1167_v57 = vmul.f32 1.442695, %v1158_v36  ;;  %v1157_v6 = vsub.f32 %v1125_v40, %v1135_v56 }
 0x5f2   : > { %3948 = vpow2.f32 %v1167_v57  ;;  %v1165_v7 = vmul.f32 1.442695, %v1157_v6 }
 0x5f3   : > { %v1144_v45 = vpop.xlane.xlu0 %1143 }
 0x5f4   : > { %3950 = vpow2.f32 %v1165_v7  ;;  %v1160_v50 = vsub.f32 %v1128_v46, %v1144_v45 }
 0x5f6   : > { %v1171_v8 = vmul.f32 1.442695, %v1160_v50 }
 0x5f7   : > { %v1150_v11 = vpop.xlane.xlu1 %1149  ;;  %v1141_v55 = vpop.xlane.xlu0 %1140 }
 0x5f8   : > { %3952 = vpow2.f32 %v1171_v8  ;;  %v1162_v3 = vsub.f32 %v1130_v54, %v1150_v11  ;;  %v1159_v17 = vsub.f32 %v1127_v52, %v1141_v55 }
 0x5fa   : > { %v1175_v19 = vmul.f32 1.442695, %v1162_v3  ;;  %v1169_v20 = vmul.f32 1.442695, %v1159_v17 }
 0x5fb   : > { %v1156_v23 = vpop.xlane.xlu1 %1155  ;;  %v1147_v26 = vpop.xlane.xlu0 %1146 }
 0x5fc   : > { %3954 = vpow2.f32 %v1175_v19  ;;  %v1164_v28 = vsub.f32 %v1132_v27, %v1156_v23  ;;  %v1161_v29 = vsub.f32 %v1129_v59, %v1147_v26 }
 0x5fd   : > { %3956 = vpow2.f32 %v1169_v20 }
 0x5fe   : > { %v1179_v30 = vmul.f32 1.442695, %v1164_v28  ;;  %v1173_v31 = vmul.f32 1.442695, %v1161_v29 }
 0x5ff   : > { %v4531_v32 = vpop.eup %3948  ;;  %v1153_v33 = vpop.xlane.xlu0 %1152 }
 0x600   : > { %3958 = vpow2.f32 %v1179_v30  ;;  %v1163_v35 = vsub.f32 %v1131_v62, %v1153_v33  ;;  %v1184_v37 = vsel %vm774_vm2, %v4531_v32, 0.0  ;;  %v1222_v39 = vpop.permute.xlu1 %1221 }
 0x601   : > { %v4535_v38 = vpop.eup %3950  ;;  %3960 = vpow2.f32 %v1173_v31  ;;  %1185 = vadd.xlane.f32.xlu1 %v1184_v37 }
 0x602   : > { %v1177_v40 = vmul.f32 1.442695, %v1163_v35  ;;  %v1181_v42 = vsel %vm774_vm2, %v4535_v38, 0.0 }
 0x603   : > { %1182 = vadd.xlane.f32.xlu0 %v1181_v42  ;;  %v1224_v43 = vpop.permute.xlu0 %1223 }
 0x604   : > { %3962 = vpow2.f32 %v1177_v40  ;;  %3677 = vmatprep.subr.mxu1 %v1224_v43  ;;  %v4543_v51 = vpop.permute.xlu1 %1310 }
 0x605   : > { %v4539_v44 = vpop.eup %3952  ;;  %3678 = vmatpush3.msra.mxu1 %v1224_v43 }
 0x606   : > { %3679 = vmatprep.subr.mxu1 %v1222_v39  ;;  %v1190_v46 = vsel %vm774_vm2, %v4539_v44, 0.0 }
 0x607   : > { %1191 = vadd.xlane.f32.xlu1 %v1190_v46  ;;  %3680 = vmatpush3.msra.mxu1 %v1222_v39  ;;  %v4545_v52 = vpop.permute.xlu0 %1397 }
 0x608   : > { %3684 = vmatprep.subr.mxu1 %v4543_v51  ;;  %v1309_v34 = vpop.permute.xlu1 %1308 }
 0x609   : > { %v4548_v53 = vpop.eup %3954 }
 0x60a   : > { %v4550_v10 = vpop.eup %3956  ;;  %v1196_v54 = vsel %vm774_vm2, %v4548_v53, 0.0 }
 0x60b   : > { %1197 = vadd.xlane.f32.xlu1 %v1196_v54  ;;  %v1187_v41 = vsel %vm774_vm2, %v4550_v10, 0.0  ;;  %v1485_v59 = vpop.permute.xlu0 %1484 }
 0x60c   : > { %1188 = vadd.xlane.f32.xlu0 %v1187_v41  ;;  %3698 = vmatprep.subr.mxu0 %v1485_v59  ;;  %v1396_v1 = vpop.permute.xlu1 %1395 }
 0x60d   : > { %v4556_v61 = vpop.eup %3958  ;;  %3699 = vmatpush3.msra.mxu0 %v1485_v59 }
 0x60e   : > { %v4558_v48 = vpop.eup %3960  ;;  %v1202_v25 = vsel %vm774_vm2, %v4556_v61, 0.0 }
 0x60f   : > { %1203 = vadd.xlane.f32.xlu1 %v1202_v25  ;;  %v1193_v27 = vsel %vm774_vm2, %v4558_v48, 0.0  ;;  %v1483_v47 = vpop.permute.xlu0 %1482 }
 0x610   : > { %1194 = vadd.xlane.f32.xlu0 %v1193_v27  ;;  %3700 = vmatprep.subr.mxu0 %v1483_v47  ;;  %v1576_v36 = vpop.permute.xlu1 %1575 }
 0x611   : > { %v4564_v62 = vpop.eup %3962  ;;  %3701 = vmatpush3.msra.mxu0 %v1483_v47 }
 0x612   : > { %v1199_v63 = vsel %vm774_vm2, %v4564_v62, 0.0 }
 0x613   : > { %v4568_v0 = vpop.permute.xlu0 %1666 }
 0x614   : > { %1200 = vadd.xlane.f32.xlu0 %v1199_v63  ;;  %3712 = vmatprep.subr.msk.mxu0 %vm774_vm2, %v4568_v0  ;;  %v1574_v56 = vpop.permute.xlu1 %1573 }
 0x617   : > { %v4590_v7 = vpop.permute.xlu0 %1571 }
 0x618   : > { %v1570_v57 = vpop.permute.xlu1 %1569 }
 0x61b   : > { %v4592_v50 = vpop.permute.xlu0 %1757 }
 0x61c   : > { %v4588_v6 = vpop.permute.xlu1 %1664 }
 0x620   : > { %1755 = vrot.lane.b32.xlu1 %v4464_v22, %s4157_s6  ;;  %v1661_v45 = vpop.permute.xlu1 %1660 }
 0x624   : > { %1751 = vrot.lane.b32.xlu1 %v4464_v22, %s4158_s7 }
 0x628   : > { %1846 = vrot.lane.b32.xlu1 %v4468_v24, %s4157_s6 }
 0x62a   : > { %1662 = vrot.lane.b32.xlu0 %v4451_v14, %s4158_s7 }
 0x62c   : > { %1844 = vrot.lane.b32.xlu1 %v4461_v21, %s4158_s7 }
 0x62e   : > { %1848 = vrot.lane.b32.xlu0 %v4461_v21, %s4157_s6 }
 0x632   : > { %1753 = vrot.lane.b32.xlu0 %v4455_v18, %s4158_s7 }
 0x636   : > { %1842 = vrot.lane.b32.xlu0 %v4468_v24, %s4158_s7 }
 0x68a   : > { %v1186_v8 = vpop.xlane.xlu1 %1185 }
 0x68b   : > { %3964 = vrcp.f32 %v1186_v8 }
 0x68c   : > { %v1183_v11 = vpop.xlane.xlu0 %1182 }
 0x68d   : > { %3966 = vrcp.f32 %v1183_v11 }
 0x690   : > { %v1192_v55 = vpop.xlane.xlu1 %1191 }
 0x691   : > { %3968 = vrcp.f32 %v1192_v55 }
 0x694   : > { %v1198_v3 = vpop.xlane.xlu1 %1197 }
 0x695   : > { %v1189_v17 = vpop.xlane.xlu0 %1188 }
 0x696   : > { %3970 = vrcp.f32 %v1189_v17 }
 0x697   : > { %3972 = vrcp.f32 %v1198_v3 }
 0x698   : > { %v3965_v19 = vpop.eup %3964  ;;  %v1204_v26 = vpop.xlane.xlu1 %1203 }
 0x699   : > { %v1195_v20 = vpop.xlane.xlu0 %1194  ;;  %v1214_v29 = vmul.f32 %v3965_v19, %v4531_v32 }
 0x69a   : > { %v3967_v23 = vpop.eup %3966  ;;  %3974 = vrcp.f32 %v1195_v20 }
 0x69b   : > { %v1213_v28 = vmul.f32 %v3967_v23, %v4535_v38  ;;  %3976 = vrcp.f32 %v1204_v26 }
 0x69d   : > { %v1201_v30 = vpop.xlane.xlu0 %1200  ;;  %3681 = vmatprep.mubr.msk.f32.mxu1 %vm774_vm2, %v1213_v28 }
 0x69e   : > { %3978 = vrcp.f32 %v1201_v30  ;;  %3682 = vmatmul.mubr.msk.f32.vlgmr.msra.gmra.mxu1 %vm774_vm2, %v1214_v29  ;;  %v3969_v31 = vpop.eup %3968 }
 0x69f   : > { %3685 = vmatpush3.msra.mxu1 %v4543_v51  ;;  %v1216_v37 = vmul.f32 %v3969_v31, %v4539_v44  ;;  %v1756_v44 = vpop.permute.xlu1 %1755 }
 0x6a0   : > { %3686 = vmatprep.subr.mxu1 %v1309_v34 }
 0x6a1   : > { %3687 = vmatpush3.msra.mxu1 %v1309_v34  ;;  %v1663_v38 = vpop.permute.xlu0 %1662 }
 0x6a2   : > { %3691 = vmatprep.subr.mxu1 %v4545_v52 }
 0x6a3   : > { %v3971_v33 = vpop.eup %3970 }
 0x6a4   : > { %v1215_v35 = vmul.f32 %v3971_v33, %v4550_v10  ;;  %v3973_v32 = vpop.eup %3972  ;;  %v1752_v10 = vpop.permute.xlu1 %1751 }
 0x6a5   : > { %v1218_v42 = vmul.f32 %v3973_v32, %v4548_v53  ;;  %v1849_v51 = vpop.permute.xlu0 %1848 }
 0x6a6   : > { %3688 = vmatprep.mubr.msk.f32.mxu1 %vm774_vm2, %v1215_v35 }
 0x6a7   : > { %v3975_v39 = vpop.eup %3974  ;;  %3689 = vmatmul.mubr.msk.f32.vlgmr.msra.gmra.mxu1 %vm774_vm2, %v1216_v37 }
 0x6a8   : > { %3692 = vmatpush3.msra.mxu1 %v4545_v52  ;;  %v1217_v40 = vmul.f32 %v3975_v39, %v4558_v48  ;;  %v3977_v43 = vpop.eup %3976  ;;  %v1847_v41 = vpop.permute.xlu1 %1846 }
 0x6a9   : > { %3693 = vmatprep.subr.mxu1 %v1396_v1  ;;  %v1220_v53 = vmul.f32 %v3977_v43, %v4556_v61  ;;  %v1754_v54 = vpop.permute.xlu0 %1753 }
 0x6aa   : > { %3694 = vmatpush3.msra.mxu1 %v1396_v1  ;;  %3695 = vmatprep.mubr.msk.f32.mxu1 %vm774_vm2, %v1217_v40 }
 0x6ab   : > { %v3979_v46 = vpop.eup %3978  ;;  %3705 = vmatprep.subr.msk.mxu1 %vm774_vm2, %v1576_v36  ;;  %3696 = vmatmul.mubr.msk.f32.vlgmr.msra.gmra.mxu1 %vm774_vm2, %v1218_v42 }
 0x6ac   : > { %3706 = vmatpush3.xpose.msk.msra.mxu1 %vm774_vm2, %v1576_v36  ;;  %3709 = vmatprep.mubr.msk.f32.mxu1 %vm774_vm2, %v1570_v57  ;;  %v1219_v52 = vmul.f32 %v3979_v46, %v4564_v62  ;;  %v1845_v61 = vpop.permute.xlu1 %1844 }
 0x6ad   : > { %3707 = vmatprep.subr.msk.mxu1 %vm774_vm2, %v1574_v56  ;;  %v1843_v59 = vpop.permute.xlu0 %1842 }
 0x6ae   : > { %3702 = vmatprep.mubr.msk.f32.mxu0 %vm774_vm2, %v1219_v52 }
 0x6af   : > { %3703 = vmatmul.mubr.msk.f32.vlgmr.msra.gmra.mxu0 %vm774_vm2, %v1220_v53 }
 0x6b0   : > { %3708 = vmatpush3.xpose.msk.msra.mxu1 %vm774_vm2, %v1574_v56  ;;  %3713 = vmatpush3.xpose.msk.msra.mxu0 %vm774_vm2, %v4568_v0 }
 0x6b1   : > { %3714 = vmatprep.subr.msk.mxu0 %vm774_vm2, %v4588_v6  ;;  %3716 = vmatprep.mubr.msk.f32.mxu0 %vm774_vm2, %v1661_v45 }
 0x6b2   : > { %3719 = vmatprep.subr.msk.mxu1 %vm774_vm2, %v4592_v50 }
 0x6b3   : > { %3710 = vmatmul.mubr.msk.f32.vlgmr.msra.gmra.mxu1 %vm774_vm2, %v4590_v7 }
 0x6b4   : > { %3715 = vmatpush3.xpose.msk.msra.mxu0 %vm774_vm2, %v4588_v6  ;;  %3720 = vmatpush3.xpose.msk.msra.mxu1 %vm774_vm2, %v4592_v50 }
 0x6b5   : > { %3723 = vmatprep.mubr.msk.f32.mxu1 %vm774_vm2, %v1752_v10  ;;  %3721 = vmatprep.subr.msk.mxu1 %vm774_vm2, %v1756_v44 }
 0x6b6   : > { %3726 = vmatprep.subr.msk.mxu0 %vm774_vm2, %v1849_v51 }
 0x6b7   : > { %3717 = vmatmul.mubr.msk.f32.vlgmr.msra.gmra.mxu0 %vm774_vm2, %v1663_v38 }
 0x6b8   : > { %3722 = vmatpush3.xpose.msk.msra.mxu1 %vm774_vm2, %v1756_v44  ;;  %3727 = vmatpush3.xpose.msk.msra.mxu0 %vm774_vm2, %v1849_v51 }
 0x6b9   : > { %3730 = vmatprep.mubr.msk.f32.mxu0 %vm774_vm2, %v1843_v59  ;;  %3728 = vmatprep.subr.msk.mxu0 %vm774_vm2, %v1847_v41 }
 0x6bb   : > { %3724 = vmatmul.mubr.msk.f32.vlgmr.msra.gmra.mxu1 %vm774_vm2, %v1754_v54 }
 0x6bc   : > { %3729 = vmatpush3.xpose.msk.msra.mxu0 %vm774_vm2, %v1847_v41 }
 0x6bf   : > { %3731 = vmatmul.mubr.msk.f32.vlgmr.msra.gmra.mxu0 %vm774_vm2, %v1845_v61 }
 0x75e   : > { %v4642_v48 = vpop.f32.mrf.mxu1 }
 0x760   : > { %v4644_v25 = vpop.f32.mrf.mxu1 }
 0x767   : > { %v4646_v27 = vpop.f32.mrf.mxu1 }
 0x769   : > { %v4648_v47 = vpop.f32.mrf.mxu1 }
 0x76b   : > { %v4650_v62 = vpop.f32.mrf.mxu1 }
 0x76d   : > { %v4652_v63 = vpop.f32.mrf.mxu1 }
 0x76f   : > { %v4654_v0 = vpop.f32.mrf.mxu0 }
 0x771   : > { %v4656_v36 = vpop.f32.mrf.mxu0 }
 0x773   : > { %v3711_v34 = vpop.f32.mrf.mxu1 }
 0x774   : > { %v1934_v1 = vmul.f32 0.25, %v3711_v34 }
 0x775   : > { %v1651_v56 = vpop.f32.mrf.mxu1 }
 0x776   : > { %v1933_v57 = vmul.f32 0.25, %v1651_v56  ;;  %v1944_v6 = vsel %vm774_vm2, %v1934_v1, -inf }
 0x777   : > { %1945 = vmax.xlane.f32.xlu1 %v1944_v6  ;;  %v3718_v7 = vpop.f32.mrf.mxu0 }
 0x778   : > { %v1936_v45 = vmul.f32 0.25, %v3718_v7  ;;  %v1941_v50 = vsel %vm774_vm2, %v1933_v57, -inf }
 0x779   : > { %1942 = vmax.xlane.f32.xlu0 %v1941_v50  ;;  %v1742_v8 = vpop.f32.mrf.mxu0 }
 0x77a   : > { %v1935_v55 = vmul.f32 0.25, %v1742_v8  ;;  %v1950_v17 = vsel %vm774_vm2, %v1936_v45, -inf }
 0x77b   : > { %v3725_v11 = vpop.f32.mrf.mxu1 }
 0x77c   : > { %v1938_v3 = vmul.f32 0.25, %v3725_v11  ;;  %v1947_v29 = vsel %vm774_vm2, %v1935_v55, -inf }
 0x77d   : > { %1951 = vmax.xlane.f32.xlu0 %v1950_v17  ;;  %v1833_v19 = vpop.f32.mrf.mxu1 }
 0x77e   : > { %v1956_v20 = vsel %vm774_vm2, %v1938_v3, -inf  ;;  %v1937_v26 = vmul.f32 0.25, %v1833_v19 }
 0x77f   : > { %1957 = vmax.xlane.f32.xlu1 %v1956_v20  ;;  %v3732_v23 = vpop.f32.mrf.mxu0 }
 0x780   : > { %v1940_v28 = vmul.f32 0.25, %v3732_v23  ;;  %v1953_v35 = vsel %vm774_vm2, %v1937_v26, -inf }
 0x781   : > { %1948 = vmax.xlane.f32.xlu0 %v1947_v29  ;;  %v1924_v30 = vpop.f32.mrf.mxu0 }
 0x782   : > { %v1962_v31 = vsel %vm774_vm2, %v1940_v28, -inf  ;;  %v1939_v33 = vmul.f32 0.25, %v1924_v30 }
 0x783   : > { %1963 = vmax.xlane.f32.xlu1 %v1962_v31 }
 0x784   : > { %v1959_v37 = vsel %vm774_vm2, %v1939_v33, -inf }
 0x785   : > { %1954 = vmax.xlane.f32.xlu0 %v1953_v35 }
 0x789   : > { %1960 = vmax.xlane.f32.xlu0 %v1959_v37 }
 0x794   : > { %2029 = vrot.lane.b32.xlu1 %v4445_v13, %s4159_s8 }
 0x798   : > { %2118 = vrot.lane.b32.xlu1 %v4451_v14, %s4159_s8 }
 0x79c   : > { %2116 = vrot.lane.b32.xlu1 %v4453_v15, %s4159_s8 }
 0x79f   : > { %2031 = vrot.lane.b32.xlu0 %v4443_v9, %s4159_s8 }
 0x7a0   : > { %2203 = vrot.lane.b32.xlu1 %v4464_v22, %s4159_s8 }
 0x7a3   : > { %2205 = vrot.lane.b32.xlu0 %v4455_v18, %s4159_s8 }
 0x800   : > { %v1946_v32 = vpop.xlane.xlu1 %1945 }
 0x801   : > { %v1966_v38 = vsub.f32 %v1934_v1, %v1946_v32 }
 0x802   : > { %v1943_v39 = vpop.xlane.xlu0 %1942 }
 0x803   : > { %v1975_v40 = vmul.f32 1.442695, %v1966_v38  ;;  %v1965_v13 = vsub.f32 %v1933_v57, %v1943_v39 }
 0x805   : > { %3980 = vpow2.f32 %v1975_v40  ;;  %v1973_v42 = vmul.f32 1.442695, %v1965_v13 }
 0x806   : > { %v1952_v14 = vpop.xlane.xlu0 %1951 }
 0x807   : > { %3982 = vpow2.f32 %v1973_v42  ;;  %v1968_v43 = vsub.f32 %v1936_v45, %v1952_v14 }
 0x808   : > { %v1958_v15 = vpop.xlane.xlu1 %1957 }
 0x809   : > { %v1979_v46 = vmul.f32 1.442695, %v1968_v43  ;;  %v1970_v44 = vsub.f32 %v1938_v3, %v1958_v15 }
 0x80a   : > { %v1949_v9 = vpop.xlane.xlu0 %1948 }
 0x80b   : > { %3984 = vpow2.f32 %v1979_v46  ;;  %v1983_v51 = vmul.f32 1.442695, %v1970_v44  ;;  %v1967_v22 = vsub.f32 %v1935_v55, %v1949_v9 }
 0x80c   : > { %v1964_v52 = vpop.xlane.xlu1 %1963 }
 0x80d   : > { %3986 = vpow2.f32 %v1983_v51  ;;  %v1977_v18 = vmul.f32 1.442695, %v1967_v22  ;;  %v1972_v53 = vsub.f32 %v1940_v28, %v1964_v52 }
 0x80e   : > { %v1955_v10 = vpop.xlane.xlu0 %1954 }
 0x80f   : > { %3988 = vpow2.f32 %v1977_v18  ;;  %v1987_v54 = vmul.f32 1.442695, %v1972_v53  ;;  %v1969_v41 = vsub.f32 %v1937_v26, %v1955_v10 }
 0x810   : > { %v2030_v59 = vpop.permute.xlu1 %2029 }
 0x811   : > { %3990 = vpow2.f32 %v1987_v54  ;;  %v1981_v61 = vmul.f32 1.442695, %v1969_v41 }
 0x812   : > { %v4678_v34 = vpop.eup %3980  ;;  %v1961_v1 = vpop.xlane.xlu0 %1960 }
 0x813   : > { %3992 = vpow2.f32 %v1981_v61  ;;  %v1971_v56 = vsub.f32 %v1939_v33, %v1961_v1  ;;  %v1992_v57 = vsel %vm774_vm2, %v4678_v34, 0.0 }
 0x814   : > { %v3983_v6 = vpop.eup %3982  ;;  %1993 = vadd.xlane.f32.xlu1 %v1992_v57  ;;  %v2119_v7 = vpop.permute.xlu1 %2118  ;;  %v195_v57 = vld [vmem:[#allocation2 + $0x60] sm:$0xff] }
 0x815   : > { %v1985_v45 = vmul.f32 1.442695, %v1971_v56  ;;  %3740 = vmatprep.subr.mxu0 %v2119_v7  ;;  %v1989_v50 = vsel %vm774_vm2, %v3983_v6, 0.0  ;;  %v196_v56 = vld [vmem:[#allocation2 + $0x68] sm:$0xff] }
 0x816   : > { %3741 = vmatpush3.msra.mxu0 %v2119_v7  ;;  %1990 = vadd.xlane.f32.xlu0 %v1989_v50  ;;  %v2032_v8 = vpop.permute.xlu0 %2031  ;;  %v193_v7 = vld [vmem:[#allocation2 + $0x50] sm:$0xff] }
 0x817   : > { %3994 = vpow2.f32 %v1985_v45  ;;  %3733 = vmatprep.subr.mxu1 %v2032_v8 }
 0x818   : > { %v3985_v11 = vpop.eup %3984  ;;  %v2117_v55 = vpop.permute.xlu1 %2116  ;;  %3734 = vmatpush3.msra.mxu1 %v2032_v8 }
 0x819   : > { %3735 = vmatprep.subr.mxu1 %v2030_v59  ;;  %3742 = vmatprep.subr.mxu0 %v2117_v55  ;;  %v1998_v3 = vsel %vm774_vm2, %v3985_v11, 0.0 }
 0x81a   : > { %v4684_v17 = vpop.eup %3986  ;;  %3743 = vmatpush3.msra.mxu0 %v2117_v55  ;;  %1999 = vadd.xlane.f32.xlu1 %v1998_v3  ;;  %v2206_v19 = vpop.permute.xlu0 %2205 }
 0x81b   : > { %3736 = vmatpush3.msra.mxu1 %v2030_v59  ;;  %v2004_v23 = vsel %vm774_vm2, %v4684_v17, 0.0 }
 0x81c   : > { %v3989_v20 = vpop.eup %3988  ;;  %3747 = vmatprep.subr.mxu1 %v2206_v19  ;;  %v2204_v37 = vpop.permute.xlu1 %2203 }
 0x81d   : > { %v1995_v26 = vsel %vm774_vm2, %v3989_v20, 0.0 }
 0x81e   : > { %v3991_v28 = vpop.eup %3990  ;;  %2005 = vadd.xlane.f32.xlu1 %v2004_v23  ;;  %1996 = vadd.xlane.f32.xlu0 %v1995_v26 }
 0x81f   : > { %v2010_v30 = vsel %vm774_vm2, %v3991_v28, 0.0 }
 0x820   : > { %v3993_v29 = vpop.eup %3992 }
 0x821   : > { %v2001_v31 = vsel %vm774_vm2, %v3993_v29, 0.0 }
 0x822   : > { %2011 = vadd.xlane.f32.xlu1 %v2010_v30  ;;  %2002 = vadd.xlane.f32.xlu0 %v2001_v31 }
 0x824   : > { %v3995_v33 = vpop.eup %3994 }
 0x825   : > { %v2007_v35 = vsel %vm774_vm2, %v3995_v33, 0.0 }
 0x826   : > { %2008 = vadd.xlane.f32.xlu0 %v2007_v35 }
 0x833   : > { %2290 = vrot.lane.b32.xlu1 %v4468_v24, %s4159_s8 }
 0x83c   : > { %2292 = vrot.lane.b32.xlu0 %v4461_v21, %s4159_s8  ;;  %s176_s8 = sand.u32 1, %s4142_s13  }
 0x83d   : > { %s177_s10 = scalar_lea.vmem [#allocation5], %s176_s8  ;;  %s3276_s24 = scalar_lea.sflag [#allocation4], %s176_s8 }
 0x83e   : > { %s3288_s11 = sshll.u32 %s177_s10, 4  ;;  %s3289_s11 = int_to_ptr.vmem [resolvable:$true] %s3288_s11 }
 0x83f   : > { %s4086_s25 = scalar_lea.vmem %s3289_s11, 16  ;;  %p4093_p11 = scmp.lt.s32.totalorder %s3289_s11, %s4091_s27 }
 0x840   : > { %p4087_p6 = scmp.ne.s32.totalorder %s3289_s11, %s4086_s25 }
 0x842   : > { %p4088_p9 = pnand %p4087_p6, %p4222_p5 }
 0x844   : > { %p4089_p10 = pneg %p4088_p9 }
 0x89d   : > { %v1994_v32 = vpop.xlane.xlu1 %1993 }
 0x89e   : > { %3996 = vrcp.f32 %v1994_v32 }
 0x89f   : > { %v1991_v38 = vpop.xlane.xlu0 %1990 }
 0x8a0   : > { %3998 = vrcp.f32 %v1991_v38 }
 0x8a3   : > { %v2000_v39 = vpop.xlane.xlu1 %1999 }
 0x8a4   : > { %4000 = vrcp.f32 %v2000_v39 }
 0x8a7   : > { %v2006_v40 = vpop.xlane.xlu1 %2005  ;;  %v1997_v13 = vpop.xlane.xlu0 %1996 }
 0x8a8   : > { %4002 = vrcp.f32 %v1997_v13 }
 0x8a9   : > { %4004 = vrcp.f32 %v2006_v40 }
 0x8ab   : > { %v2003_v42 = vpop.xlane.xlu0 %2002  ;;  %v3997_v14 = vpop.eup %3996 }
 0x8ac   : > { %v2012_v43 = vpop.xlane.xlu1 %2011  ;;  %4006 = vrcp.f32 %v2003_v42  ;;  %v2022_v21 = vmul.f32 %v3997_v14, %v4678_v34 }
 0x8ad   : > { %v3999_v15 = vpop.eup %3998  ;;  %4008 = vrcp.f32 %v2012_v43 }
 0x8ae   : > { %v2021_v24 = vmul.f32 %v3999_v15, %v3983_v6  ;;  %v194_v6 = vld [vmem:[#allocation2 + $0x58] sm:$0xff] }
 0x8af   : > { %v2009_v46 = vpop.xlane.xlu0 %2008 }
 0x8b0   : > { %4010 = vrcp.f32 %v2009_v46  ;;  %3737 = vmatprep.mubr.msk.f32.mxu1 %vm774_vm2, %v2021_v24  ;;  %v2291_v10 = vpop.permute.xlu1 %2290 }
 0x8b1   : > { %3738 = vmatmul.mubr.msk.f32.vlgmr.msra.gmra.mxu1 %vm774_vm2, %v2022_v21  ;;  %v4001_v9 = vpop.eup %4000 }
 0x8b2   : > { %3748 = vmatpush3.msra.mxu1 %v2206_v19  ;;  %v2024_v52 = vmul.f32 %v4001_v9, %v3985_v11 }
 0x8b3   : > { %3749 = vmatprep.subr.mxu1 %v2204_v37  ;;  %v2293_v44 = vpop.permute.xlu0 %2292 }
 0x8b4   : > { %3750 = vmatpush3.msra.mxu1 %v2204_v37  ;;  %3754 = vmatprep.subr.mxu0 %v2293_v44 }
 0x8b5   : > { %v4003_v51 = vpop.eup %4002  ;;  %3761 = vmatprep.subr.mxu1 %v196_v56 }
 0x8b6   : > { %v2023_v22 = vmul.f32 %v4003_v51, %v3989_v20  ;;  %v4005_v18 = vpop.eup %4004 }
 0x8b7   : > { %v2026_v59 = vmul.f32 %v4005_v18, %v4684_v17 }
 0x8b8   : > { %3744 = vmatprep.mubr.msk.f32.mxu0 %vm774_vm2, %v2023_v22 }
 0x8b9   : > { %v4007_v53 = vpop.eup %4006  ;;  %3745 = vmatmul.mubr.msk.f32.vlgmr.msra.gmra.mxu0 %vm774_vm2, %v2024_v52 }
 0x8ba   : > { %3755 = vmatpush3.msra.mxu0 %v2293_v44  ;;  %v2025_v54 = vmul.f32 %v4007_v53, %v3993_v29  ;;  %v4009_v41 = vpop.eup %4008 }
 0x8bb   : > { %3756 = vmatprep.subr.mxu0 %v2291_v10  ;;  %v2028_v1 = vmul.f32 %v4009_v41, %v3991_v28 }
 0x8bc   : > { %3757 = vmatpush3.msra.mxu0 %v2291_v10  ;;  %3751 = vmatprep.mubr.msk.f32.mxu1 %vm774_vm2, %v2025_v54 }
 0x8bd   : > { %v4011_v61 = vpop.eup %4010  ;;  %3752 = vmatmul.mubr.msk.f32.vlgmr.msra.gmra.mxu1 %vm774_vm2, %v2026_v59 }
 0x8be   : > { %v2027_v34 = vmul.f32 %v4011_v61, %v3995_v33  ;;  %3762 = vmatpush3.msra.mxu1 %v196_v56 }
 0x8bf   : > { %3763 = vmatprep.subr.mxu1 %v195_v57 }
 0x8c0   : > { %3758 = vmatprep.mubr.msk.f32.mxu0 %vm774_vm2, %v2027_v34  ;;  %3764 = vmatpush3.msra.mxu1 %v195_v57 }
 0x8c1   : > { %3759 = vmatmul.mubr.msk.f32.vlgmr.msra.gmra.mxu0 %vm774_vm2, %v2028_v1  ;;  %3765 = vmatprep.subr.mxu1 %v194_v6 }
 0x8c2   : > { %3766 = vmatpush3.msra.mxu1 %v194_v6 }
 0x8c3   : > { %3767 = vmatprep.subr.mxu1 %v193_v7 }
 0x8c4   : > { %3768 = vmatpush3.msra.mxu1 %v193_v7 }
 0x971   : > { %v3739_v45 = vpop.f32.mrf.mxu1 }
 0x972   : > { %2387 = vrot.lane.b32.xlu1 %v3739_v45, %s4160_s9 }
 0x973   : > { %v2107_v50 = vpop.f32.mrf.mxu1 }
 0x974   : > { %2385 = vrot.lane.b32.xlu0 %v2107_v50, %s4160_s9 }
 0x979   : > { %v3746_v8 = vpop.f32.mrf.mxu0 }
 0x97a   : > { %2391 = vrot.lane.b32.xlu1 %v3746_v8, %s4160_s9 }
 0x97b   : > { %v2194_v11 = vpop.f32.mrf.mxu0 }
 0x97c   : > { %2389 = vrot.lane.b32.xlu0 %v2194_v11, %s4160_s9 }
 0x97d   : > { %v3753_v55 = vpop.f32.mrf.mxu1 }
 0x97e   : > { %2395 = vrot.lane.b32.xlu1 %v3753_v55, %s4160_s9 }
 0x97f   : > { %v2281_v3 = vpop.f32.mrf.mxu1 }
 0x980   : > { %2393 = vrot.lane.b32.xlu0 %v2281_v3, %s4160_s9 }
 0x981   : > { %v3760_v17 = vpop.f32.mrf.mxu0 }
 0x982   : > { %2399 = vrot.lane.b32.xlu1 %v3760_v17, %s4160_s9 }
 0x983   : > { %v2368_v19 = vpop.f32.mrf.mxu0 }
 0x984   : > { %2397 = vrot.lane.b32.xlu0 %v2368_v19, %s4160_s9  ;;  %s3458_s9 = sshll.u32 %s4205_s16, 4  ;;  %s4092_s16 = scalar_lea.vmem %s4091_s27, 32 }
 0x985   : > { %s3286_s20 = scalar_lea.hbm %s5017_s3, %s3458_s9  ;;  %p4094_p12 = scmp.lt.s32.totalorder %s4092_s16, %s4086_s25 }
 0x987   : > { %p4095_p13 = por %p4094_p12, %p4093_p11 }
 0x989   : > { %p4096_p0 = pnand %p4095_p13, %p4089_p10 }
 0x9e4   : > { %v2388_v20 = vpop.permute.xlu1 %2387 }
 0x9e5   : > { %v2410_v28 = vsel %vm774_vm2, %v4642_v48, %v2388_v20 }
 0x9e6   : > { %v2386_v23 = vpop.permute.xlu0 %2385 }
 0x9e7   : > { %v2409_v26 = vsel %vm774_vm2, %v4644_v25, %v2386_v23 }
 0x9e8   : > { %3769 = vmatprep.mubr.msk.f32.mxu1 %vm377_vm1, %v2409_v26 }
 0x9e9   : > { %3770 = vmatmul.mubr.msk.f32.vlgmr.msra.gmra.mxu1 %vm377_vm1, %v2410_v28 }
 0x9ec   : > { %v2392_v29 = vpop.permute.xlu1 %2391 }
 0x9ed   : > { %v2412_v33 = vsel %vm774_vm2, %v4646_v27, %v2392_v29 }
 0x9ee   : > { %v2390_v30 = vpop.permute.xlu0 %2389 }
 0x9ef   : > { %v2411_v31 = vsel %vm774_vm2, %v4648_v47, %v2390_v30 }
 0x9f0   : > { %v2396_v35 = vpop.permute.xlu1 %2395  ;;  %3772 = vmatprep.mubr.msk.f32.mxu1 %vm377_vm1, %v2411_v31 }
 0x9f1   : > { %3773 = vmatmul.mubr.msk.f32.gmra.mxu1 %vm377_vm1, %v2412_v33  ;;  %v2414_v37 = vsel %vm774_vm2, %v4650_v62, %v2396_v35  ;;  %v3433_v62 = vld [vmem:[%s5016_s2 + $0x4] ss:$0 sm:$0xff] }
 0x9f2   : > { %v2394_v25 = vpop.permute.xlu0 %2393 }
 0x9f3   : > { %v2413_v48 = vsel %vm774_vm2, %v4652_v63, %v2394_v25 }
 0x9f4   : > { %3775 = vmatprep.mubr.msk.f32.mxu1 %vm377_vm1, %v2413_v48  ;;  %v2400_v32 = vpop.permute.xlu1 %2399 }
 0x9f5   : > { %3776 = vmatmul.mubr.msk.f32.gmra.mxu1 %vm377_vm1, %v2414_v37  ;;  %v2416_v38 = vsel %vm774_vm2, %v4654_v0, %v2400_v32 }
 0x9f6   : > { %v2398_v47 = vpop.permute.xlu0 %2397 }
 0x9f7   : > { %v2415_v27 = vsel %vm774_vm2, %v4656_v36, %v2398_v47 }
 0x9f8   : > { %3778 = vmatprep.mubr.msk.f32.mxu1 %vm377_vm1, %v2415_v27 }
 0x9f9   : > { %3779 = vmatmul.mubr.msk.f32.gmra.mxu1 %vm377_vm1, %v2416_v38 }
 0xaa9   : > { %v3771_v63 = vpop.f32.mrf.mxu1 }
 0xaaa   : > { %v2517_v39 = vadd.f32 %v3771_v63, %v3433_v62 }
 0xaab   : > { %v2511_v40 = vpop.f32.mrf.mxu1 }
 0xaac   : > { %v4734_v13 = vadd.f32 %v2517_v39, %v4337_v58  ;;  %v2512_v42 = vadd.f32 %v3433_v62, %v2511_v40 }
 0xaae   : > { %v4737_v36 = vadd.f32 %v2512_v42, %v4331_v49  ;;  %v2561_v0 = vsel %vm377_vm1, %v4734_v13, 0.0 }
 0xaaf   : > { %2562 = vadd.xlane.f32.xlu1 %v2561_v0 }
 0xab0   : > { %v2558_v14 = vsel %vm377_vm1, %v4737_v36, 0.0 }
 0xab1   : > { %2559 = vadd.xlane.f32.xlu0 %v2558_v14  ;;  %v3774_v43 = vpop.f32.mrf.mxu1 }
 0xab2   : > { %v2527_v15 = vadd.f32 %v3774_v43, %v3433_v62 }
 0xab3   : > { %v2521_v24 = vpop.f32.mrf.mxu1 }
 0xab4   : > { %v4744_v46 = vadd.f32 %v2527_v15, %v4347_v4  ;;  %v2522_v58 = vadd.f32 %v3433_v62, %v2521_v24  ;;  %v200_v24 = vld [vmem:[#allocation2 + $0x88] sm:$0xff] }
 0xab5   : > { %v3777_v21 = vpop.f32.mrf.mxu1  ;;  %3781 = vmatprep.subr.mxu0 %v200_v24 }
 0xab6   : > { %v4747_v44 = vadd.f32 %v2522_v58, %v4340_v60  ;;  %v2537_v49 = vadd.f32 %v3777_v21, %v3433_v62  ;;  %v2567_v9 = vsel %vm377_vm1, %v4744_v46, 0.0  ;;  %3782 = vmatpush3.msra.mxu0 %v200_v24  ;;  %v199_v58 = vld [vmem:[#allocation2 + $0x80] sm:$0xff]  ;;  %v198_v21 = vld [vmem:[#allocation2 + $0x78] sm:$0xff] }
 0xab7   : > { %2568 = vadd.xlane.f32.xlu0 %v2567_v9  ;;  %v2531_v51 = vpop.f32.mrf.mxu1  ;;  %3783 = vmatprep.subr.mxu0 %v199_v58 }
 0xab8   : > { %v4752_v22 = vadd.f32 %v2537_v49, %v4357_v12  ;;  %v2532_v52 = vadd.f32 %v3433_v62, %v2531_v51  ;;  %v2564_v10 = vsel %vm377_vm1, %v4747_v44, 0.0  ;;  %3784 = vmatpush3.msra.mxu0 %v199_v58  ;;  %v197_v49 = vld [vmem:[#allocation2 + $0x70] sm:$0xff] }
 0xab9   : > { %v3780_v18 = vpop.f32.mrf.mxu1  ;;  %3785 = vmatprep.subr.mxu0 %v198_v21 }
 0xaba   : > { %v4755_v53 = vadd.f32 %v2532_v52, %v4350_v5  ;;  %v2547_v4 = vadd.f32 %v3780_v18, %v3433_v62  ;;  %v2573_v60 = vsel %vm377_vm1, %v4752_v22, 0.0  ;;  %3786 = vmatpush3.msra.mxu0 %v198_v21 }
 0xabb   : > { %2565 = vadd.xlane.f32.xlu0 %v2564_v10  ;;  %2574 = vadd.xlane.f32.xlu1 %v2573_v60  ;;  %v2541_v54 = vpop.f32.mrf.mxu1 }
 0xabc   : > { %v4762_v41 = vadd.f32 %v2547_v4, %v4366_v16  ;;  %v2542_v12 = vadd.f32 %v3433_v62, %v2541_v54  ;;  %v2570_v5 = vsel %vm377_vm1, %v4755_v53, 0.0  ;;  %3787 = vmatprep.subr.mxu0 %v197_v49 }
 0xabd   : > { %3788 = vmatpush3.msra.mxu0 %v197_v49 }
 0xabe   : > { %v4765_v59 = vadd.f32 %v2542_v12, %v4360_v2  ;;  %v2579_v61 = vsel %vm377_vm1, %v4762_v41, 0.0 }
 0xabf   : > { %2571 = vadd.xlane.f32.xlu0 %v2570_v5  ;;  %2580 = vadd.xlane.f32.xlu1 %v2579_v61 }
 0xac0   : > { %v2576_v34 = vsel %vm377_vm1, %v4765_v59, 0.0 }
 0xac3   : > { %2577 = vadd.xlane.f32.xlu0 %v2576_v34 }
 0xb38   : > { %v2563_v1 = vpop.xlane.xlu1 %2562 }
 0xb39   : > { %v2583_v56 = vmul.f32 0.03125, %v2563_v1 }
 0xb3a   : > { %v2560_v16 = vpop.xlane.xlu0 %2559 }
 0xb3b   : > { %v4774_v57 = vsub.f32 %v4734_v13, %v2583_v56  ;;  %v2582_v2 = vmul.f32 0.03125, %v2560_v16 }
 0xb3d   : > { %v4777_v6 = vsub.f32 %v4737_v36, %v2582_v2  ;;  %v2599_v7 = vmul.f32 %v4774_v57, %v4774_v57 }
 0xb3f   : > { %v2609_v45 = vsel %vm377_vm1, %v2599_v7, 0.0  ;;  %v2598_v50 = vmul.f32 %v4777_v6, %v4777_v6 }
 0xb40   : > { %2610 = vadd.xlane.f32.xlu1 %v2609_v45  ;;  %v2569_v8 = vpop.xlane.xlu0 %2568 }
 0xb41   : > { %v2606_v11 = vsel %vm377_vm1, %v2598_v50, 0.0  ;;  %v2585_v55 = vmul.f32 0.03125, %v2569_v8 }
 0xb42   : > { %2607 = vadd.xlane.f32.xlu0 %v2606_v11 }
 0xb43   : > { %v4786_v3 = vsub.f32 %v4744_v46, %v2585_v55  ;;  %v3442_v55 = vld [vmem:[%s5016_s2 + $0x9] ss:$0 sm:$0xff] }
 0xb44   : > { %v2575_v17 = vpop.xlane.xlu1 %2574  ;;  %v2566_v19 = vpop.xlane.xlu0 %2565 }
 0xb45   : > { %v2587_v20 = vmul.f32 0.03125, %v2575_v17  ;;  %v2584_v23 = vmul.f32 0.03125, %v2566_v19  ;;  %v2601_v26 = vmul.f32 %v4786_v3, %v4786_v3 }
 0xb47   : > { %v4791_v28 = vsub.f32 %v4752_v22, %v2587_v20  ;;  %v4794_v29 = vsub.f32 %v4747_v44, %v2584_v23  ;;  %v2615_v30 = vsel %vm377_vm1, %v2601_v26, 0.0 }
 0xb48   : > { %v2581_v31 = vpop.xlane.xlu1 %2580  ;;  %2616 = vadd.xlane.f32.xlu1 %v2615_v30  ;;  %v2572_v33 = vpop.xlane.xlu0 %2571 }
 0xb49   : > { %v2589_v35 = vmul.f32 0.03125, %v2581_v31  ;;  %v2586_v25 = vmul.f32 0.03125, %v2572_v33  ;;  %v2603_v48 = vmul.f32 %v4791_v28, %v4791_v28  ;;  %v2600_v37 = vmul.f32 %v4794_v29, %v4794_v29  ;;  %v3443_v33 = vld [vmem:[%s5016_s2 + $0xa] ss:$0 sm:$0xff] }
 0xb4b   : > { %v4802_v32 = vsub.f32 %v4762_v41, %v2589_v35  ;;  %v4805_v47 = vsub.f32 %v4755_v53, %v2586_v25  ;;  %v2621_v27 = vsel %vm377_vm1, %v2603_v48, 0.0  ;;  %v2612_v38 = vsel %vm377_vm1, %v2600_v37, 0.0 }
 0xb4c   : > { %2622 = vadd.xlane.f32.xlu1 %v2621_v27  ;;  %2613 = vadd.xlane.f32.xlu0 %v2612_v38  ;;  %v2578_v62 = vpop.xlane.xlu0 %2577 }
 0xb4d   : > { %v2588_v63 = vmul.f32 0.03125, %v2578_v62  ;;  %v2605_v39 = vmul.f32 %v4802_v32, %v4802_v32  ;;  %v2602_v40 = vmul.f32 %v4805_v47, %v4805_v47 }
 0xb4f   : > { %v4814_v42 = vsub.f32 %v4765_v59, %v2588_v63  ;;  %v2627_v0 = vsel %vm377_vm1, %v2605_v39, 0.0  ;;  %v2618_v14 = vsel %vm377_vm1, %v2602_v40, 0.0 }
 0xb50   : > { %2628 = vadd.xlane.f32.xlu1 %v2627_v0  ;;  %2619 = vadd.xlane.f32.xlu0 %v2618_v14 }
 0xb51   : > { %v2604_v43 = vmul.f32 %v4814_v42, %v4814_v42 }
 0xb53   : > { %v2624_v15 = vsel %vm377_vm1, %v2604_v43, 0.0 }
 0xb54   : > { %2625 = vadd.xlane.f32.xlu0 %v2624_v15 }
 0xbc9   : > { %v2611_v9 = vpop.xlane.xlu1 %2610 }
 0xbca   : > { %v2631_v51 = vmul.f32 0.03125, %v2611_v9 }
 0xbcb   : > { %v2608_v52 = vpop.xlane.xlu0 %2607 }
 0xbcc   : > { %v2639_v18 = vadd.f32 1e-05, %v2631_v51  ;;  %v2630_v4 = vmul.f32 0.03125, %v2608_v52 }
 0xbce   : > { %4012 = vrsqrt.f32 %v2639_v18  ;;  %v2638_v10 = vadd.f32 1e-05, %v2630_v4  ;;  %v216_v18 = vld [vmem:[#allocation2 + $0x108] sm:$0xff]  ;;  %v215_v4 = vld [vmem:[#allocation2 + $0x100] sm:$0xff] }
 0xbcf   : > { %3801 = vmatprep.subr.mxu1 %v216_v18 }
 0xbd0   : > { %4014 = vrsqrt.f32 %v2638_v10  ;;  %3802 = vmatpush3.msra.mxu1 %v216_v18  ;;  %v213_v10 = vld [vmem:[#allocation2 + $0xf0] sm:$0xff] }
 0xbd1   : > { %v2617_v60 = vpop.xlane.xlu1 %2616  ;;  %3803 = vmatprep.subr.mxu1 %v215_v4 }
 0xbd2   : > { %v2633_v54 = vmul.f32 0.03125, %v2617_v60  ;;  %3804 = vmatpush3.msra.mxu1 %v215_v4  ;;  %v212_v60 = vld [vmem:[#allocation2 + $0xe8] sm:$0xff] }
 0xbd4   : > { %v2641_v12 = vadd.f32 1e-05, %v2633_v54  ;;  %v211_v54 = vld [vmem:[#allocation2 + $0xe0] sm:$0xff] }
 0xbd5   : > { %v2623_v5 = vpop.xlane.xlu1 %2622  ;;  %v2614_v61 = vpop.xlane.xlu0 %2613 }
 0xbd6   : > { %4016 = vrsqrt.f32 %v2641_v12  ;;  %v2635_v34 = vmul.f32 0.03125, %v2623_v5  ;;  %v2632_v1 = vmul.f32 0.03125, %v2614_v61  ;;  %v210_v12 = vld [vmem:[#allocation2 + $0xd8] sm:$0xff]  ;;  %v209_v5 = vld [vmem:[#allocation2 + $0xd0] sm:$0xff]  ;;  %v208_v61 = vld [vmem:[#allocation2 + $0xc8] sm:$0xff] }
 0xbd8   : > { %v2643_v56 = vadd.f32 1e-05, %v2635_v34  ;;  %v2640_v16 = vadd.f32 1e-05, %v2632_v1  ;;  %v207_v34 = vld [vmem:[#allocation2 + $0xc0] sm:$0xff]  ;;  %v206_v1 = vld [vmem:[#allocation2 + $0xb8] sm:$0xff] }
 0xbd9   : > { %v2629_v2 = vpop.xlane.xlu1 %2628  ;;  %v2620_v7 = vpop.xlane.xlu0 %2619 }
 0xbda   : > { %4018 = vrsqrt.f32 %v2643_v56  ;;  %v2637_v50 = vmul.f32 0.03125, %v2629_v2  ;;  %v2634_v8 = vmul.f32 0.03125, %v2620_v7  ;;  %v205_v56 = vld [vmem:[#allocation2 + $0xb0] sm:$0xff]  ;;  %v203_v2 = vld [vmem:[#allocation2 + $0xa0] sm:$0xff]  ;;  %v202_v7 = vld [vmem:[#allocation2 + $0x98] sm:$0xff] }
 0xbdb   : > { %v4013_v45 = vpop.eup %4012  ;;  %4020 = vrsqrt.f32 %v2640_v16  ;;  %v204_v16 = vld [vmem:[#allocation2 + $0xa8] sm:$0xff] }
 0xbdc   : > { %v2655_v11 = vmul.f32 %v4013_v45, %v4774_v57  ;;  %v2645_v19 = vadd.f32 1e-05, %v2637_v50  ;;  %v2642_v20 = vadd.f32 1e-05, %v2634_v8  ;;  %v201_v45 = vld [vmem:[#allocation2 + $0x90] sm:$0xff] }
 0xbdd   : > { %v4015_v17 = vpop.eup %4014  ;;  %v2626_v23 = vpop.xlane.xlu0 %2625  ;;  %v3444_v50 = vld [vmem:[%s5016_s2 + $0x7] ss:$0 sm:$0xff] }
 0xbde   : > { %v2654_v26 = vmul.f32 %v4015_v17, %v4777_v6  ;;  %4022 = vrsqrt.f32 %v2645_v19  ;;  %v2636_v30 = vmul.f32 0.03125, %v2626_v23  ;;  %v2667_v31 = vmul.f32 %v3442_v55, %v2655_v11 }
 0xbdf   : > { %4024 = vrsqrt.f32 %v2642_v20 }
 0xbe0   : > { %v2666_v57 = vmul.f32 %v3442_v55, %v2654_v26  ;;  %v2644_v35 = vadd.f32 1e-05, %v2636_v30  ;;  %v2679_v48 = vadd.f32 %v3443_v33, %v2667_v31 }
 0xbe2   : > { %v2678_v25 = vadd.f32 %v3443_v33, %v2666_v57  ;;  %4026 = vrsqrt.f32 %v2644_v35 }
 0xbe3   : > { %v4017_v37 = vpop.eup %4016 }
 0xbe4   : > { %3789 = vmatprep.mubr.msk.f32.mxu0 %vm377_vm1, %v2678_v25  ;;  %v2657_v6 = vmul.f32 %v4017_v37, %v4786_v3 }
 0xbe5   : > { %3790 = vmatmul.mubr.msk.f32.vlgmr.msra.gmra.mxu0 %vm377_vm1, %v2679_v48 }
 0xbe6   : > { %v2669_v63 = vmul.f32 %v3442_v55, %v2657_v6 }
 0xbe7   : > { %v4019_v27 = vpop.eup %4018 }
 0xbe8   : > { %v4021_v38 = vpop.eup %4020  ;;  %v2659_v39 = vmul.f32 %v4019_v27, %v4791_v28  ;;  %v2681_v24 = vadd.f32 %v3443_v33, %v2669_v63 }
 0xbe9   : > { %v2656_v62 = vmul.f32 %v4021_v38, %v4794_v29 }
 0xbea   : > { %v2671_v58 = vmul.f32 %v3442_v55, %v2659_v39 }
 0xbeb   : > { %v4023_v40 = vpop.eup %4022  ;;  %v2668_v0 = vmul.f32 %v3442_v55, %v2656_v62 }
 0xbec   : > { %v4025_v14 = vpop.eup %4024  ;;  %v2661_v21 = vmul.f32 %v4023_v40, %v4802_v32  ;;  %v2683_v28 = vadd.f32 %v3443_v33, %v2671_v58 }
 0xbed   : > { %v2680_v43 = vadd.f32 %v3443_v33, %v2668_v0  ;;  %v2658_v15 = vmul.f32 %v4025_v14, %v4805_v47 }
 0xbee   : > { %v2673_v52 = vmul.f32 %v3442_v55, %v2661_v21 }
 0xbef   : > { %v4027_v49 = vpop.eup %4026  ;;  %3792 = vmatprep.mubr.msk.f32.mxu0 %vm377_vm1, %v2680_v43  ;;  %v2670_v3 = vmul.f32 %v3442_v55, %v2658_v15 }
 0xbf0   : > { %3793 = vmatmul.mubr.msk.f32.gmra.mxu0 %vm377_vm1, %v2681_v24  ;;  %v2660_v29 = vmul.f32 %v4027_v49, %v4814_v42  ;;  %v2685_v32 = vadd.f32 %v3443_v33, %v2673_v52  ;;  %v214_v42 = vld [vmem:[#allocation2 + $0xf8] sm:$0xff] }
 0xbf1   : > { %v2682_v9 = vadd.f32 %v3443_v33, %v2670_v3  ;;  %3805 = vmatprep.subr.mxu1 %v214_v42 }
 0xbf2   : > { %v2672_v51 = vmul.f32 %v3442_v55, %v2660_v29  ;;  %3806 = vmatpush3.msra.mxu1 %v214_v42 }
 0xbf3   : > { %3795 = vmatprep.mubr.msk.f32.mxu0 %vm377_vm1, %v2682_v9  ;;  %3807 = vmatprep.subr.mxu1 %v213_v10 }
 0xbf4   : > { %3796 = vmatmul.mubr.msk.f32.gmra.mxu0 %vm377_vm1, %v2683_v28  ;;  %v2684_v47 = vadd.f32 %v3443_v33, %v2672_v51  ;;  %3808 = vmatpush3.msra.mxu1 %v213_v10 }
 0xbf5   : > { %3809 = vmatprep.subr.mxu1 %v212_v60 }
 0xbf6   : > { %3798 = vmatprep.mubr.msk.f32.mxu0 %vm377_vm1, %v2684_v47  ;;  %3810 = vmatpush3.msra.mxu1 %v212_v60 }
 0xbf7   : > { %3811 = vmatprep.subr.mxu1 %v211_v54 }
 0xbf8   : > { %3799 = vmatmul.mubr.msk.f32.gmra.mxu0 %vm377_vm1, %v2685_v32  ;;  %3812 = vmatpush3.msra.mxu1 %v211_v54 }
 0xbf9   : > { %3813 = vmatprep.subr.mxu1 %v210_v12 }
 0xbfa   : > { %3814 = vmatpush3.msra.mxu1 %v210_v12 }
 0xbfb   : > { %3815 = vmatprep.subr.mxu1 %v209_v5 }
 0xbfc   : > { %3816 = vmatpush3.msra.mxu1 %v209_v5 }
 0xbfd   : > { %3817 = vmatprep.subr.mxu1 %v208_v61 }
 0xbfe   : > { %3818 = vmatpush3.msra.mxu1 %v208_v61 }
 0xbff   : > { %3819 = vmatprep.subr.mxu1 %v207_v34 }
 0xc00   : > { %3820 = vmatpush3.msra.mxu1 %v207_v34 }
 0xc01   : > { %3821 = vmatprep.subr.mxu1 %v206_v1 }
 0xc02   : > { %3822 = vmatpush3.msra.mxu1 %v206_v1 }
 0xc03   : > { %3823 = vmatprep.subr.mxu1 %v205_v56 }
 0xc04   : > { %3824 = vmatpush3.msra.mxu1 %v205_v56 }
 0xc05   : > { %3825 = vmatprep.subr.mxu1 %v204_v16 }
 0xc06   : > { %3826 = vmatpush3.msra.mxu1 %v204_v16 }
 0xc07   : > { %3827 = vmatprep.subr.mxu1 %v203_v2 }
 0xc08   : > { %3828 = vmatpush3.msra.mxu1 %v203_v2 }
 0xc09   : > { %3829 = vmatprep.subr.mxu1 %v202_v7 }
 0xc0a   : > { %3830 = vmatpush3.msra.mxu1 %v202_v7 }
 0xc0b   : > { %3831 = vmatprep.subr.mxu1 %v201_v45 }
 0xc0c   : > { %3832 = vmatpush3.msra.mxu1 %v201_v45 }
 0xca5   : > { %v3791_v8 = vpop.f32.mrf.mxu0 }
 0xca6   : > { %v4846_v11 = vadd.f32 %v3791_v8, %v3444_v50 }
 0xca7   : > { %v2780_v55 = vpop.f32.mrf.mxu0 }
 0xca8   : > { %v2820_v17 = vmul.f32 %v4846_v11, %v4846_v11  ;;  %v4850_v19 = vadd.f32 %v3444_v50, %v2780_v55 }
 0xcaa   : > { %v2828_v20 = vmul.f32 %v2820_v17, %v4846_v11  ;;  %v2819_v23 = vmul.f32 %v4850_v19, %v4850_v19 }
 0xcac   : > { %v2836_v26 = vmul.f32 0.044715, %v2828_v20  ;;  %v2827_v30 = vmul.f32 %v2819_v23, %v4850_v19 }
 0xcae   : > { %v2844_v31 = vadd.f32 %v2836_v26, %v4846_v11  ;;  %v2835_v33 = vmul.f32 0.044715, %v2827_v30 }
 0xcb0   : > { %v2852_v57 = vmul.f32 0.7978846, %v2844_v31  ;;  %v2843_v35 = vadd.f32 %v2835_v33, %v4850_v19  ;;  %v3794_v25 = vpop.f32.mrf.mxu0 }
 0xcb1   : > { %v4858_v37 = vadd.f32 %v3794_v25, %v3444_v50 }
 0xcb2   : > { %4028 = vtanh.f32 %v2852_v57  ;;  %v2851_v48 = vmul.f32 0.7978846, %v2843_v35  ;;  %v2790_v6 = vpop.f32.mrf.mxu0 }
 0xcb3   : > { %v2822_v27 = vmul.f32 %v4858_v37, %v4858_v37  ;;  %v4862_v38 = vadd.f32 %v3444_v50, %v2790_v6 }
 0xcb4   : > { %4030 = vtanh.f32 %v2851_v48  ;;  %v3797_v62 = vpop.f32.mrf.mxu0 }
 0xcb5   : > { %v2830_v63 = vmul.f32 %v2822_v27, %v4858_v37  ;;  %v2821_v39 = vmul.f32 %v4862_v38, %v4862_v38  ;;  %v4867_v40 = vadd.f32 %v3797_v62, %v3444_v50 }
 0xcb6   : > { %v2800_v0 = vpop.f32.mrf.mxu0 }
 0xcb7   : > { %v2838_v14 = vmul.f32 0.044715, %v2830_v63  ;;  %v2829_v43 = vmul.f32 %v2821_v39, %v4862_v38  ;;  %v2824_v15 = vmul.f32 %v4867_v40, %v4867_v40  ;;  %v4872_v24 = vadd.f32 %v3444_v50, %v2800_v0 }
 0xcb8   : > { %v3800_v58 = vpop.f32.mrf.mxu0 }
 0xcb9   : > { %v2846_v21 = vadd.f32 %v2838_v14, %v4858_v37  ;;  %v2837_v49 = vmul.f32 0.044715, %v2829_v43  ;;  %v2832_v3 = vmul.f32 %v2824_v15, %v4867_v40  ;;  %v2823_v29 = vmul.f32 %v4872_v24, %v4872_v24 }
 0xcba   : > { %v4878_v9 = vadd.f32 %v3800_v58, %v3444_v50  ;;  %v2810_v28 = vpop.f32.mrf.mxu0 }
 0xcbb   : > { %v2854_v51 = vmul.f32 0.7978846, %v2846_v21  ;;  %v2845_v52 = vadd.f32 %v2837_v49, %v4862_v38  ;;  %v2840_v47 = vmul.f32 0.044715, %v2832_v3  ;;  %v2831_v32 = vmul.f32 %v2823_v29, %v4872_v24 }
 0xcbc   : > { %v2826_v18 = vmul.f32 %v4878_v9, %v4878_v9  ;;  %v2811_v4 = vadd.f32 %v3444_v50, %v2810_v28 }
 0xcbd   : > { %4032 = vtanh.f32 %v2854_v51  ;;  %v2853_v42 = vmul.f32 0.7978846, %v2845_v52  ;;  %v2848_v10 = vadd.f32 %v2840_v47, %v4867_v40  ;;  %v2839_v60 = vmul.f32 0.044715, %v2831_v32 }
 0xcbe   : > { %v2834_v12 = vmul.f32 %v2826_v18, %v4878_v9  ;;  %v2825_v5 = vmul.f32 %v2811_v4, %v2811_v4 }
 0xcbf   : > { %v4029_v54 = vpop.eup %4028  ;;  %4034 = vtanh.f32 %v2853_v42  ;;  %v2856_v34 = vmul.f32 0.7978846, %v2848_v10  ;;  %v2847_v1 = vadd.f32 %v2839_v60, %v4872_v24 }
 0xcc0   : > { %v2868_v61 = vadd.f32 1.0, %v4029_v54  ;;  %v2842_v16 = vmul.f32 0.044715, %v2834_v12  ;;  %v2833_v2 = vmul.f32 %v2825_v5, %v2811_v4 }
 0xcc1   : > { %v4031_v56 = vpop.eup %4030  ;;  %4036 = vtanh.f32 %v2856_v34  ;;  %v2855_v7 = vmul.f32 0.7978846, %v2847_v1 }
 0xcc2   : > { %v2867_v45 = vadd.f32 1.0, %v4031_v56  ;;  %v2876_v50 = vmul.f32 0.5, %v2868_v61  ;;  %v2850_v8 = vadd.f32 %v2842_v16, %v4878_v9  ;;  %v2841_v55 = vmul.f32 0.044715, %v2833_v2 }
 0xcc3   : > { %4038 = vtanh.f32 %v2855_v7 }
 0xcc4   : > { %v2875_v17 = vmul.f32 0.5, %v2867_v45  ;;  %v2858_v20 = vmul.f32 0.7978846, %v2850_v8  ;;  %v2849_v23 = vadd.f32 %v2841_v55, %v2811_v4  ;;  %v2884_v30 = vmul.f32 %v2876_v50, %v4846_v11 }
 0xcc6   : > { %v2883_v26 = vmul.f32 %v2875_v17, %v4850_v19  ;;  %4040 = vtanh.f32 %v2858_v20  ;;  %v2857_v31 = vmul.f32 0.7978846, %v2849_v23 }
 0xcc8   : > { %3833 = vmatprep.mubr.f32.mxu1 %v2883_v26  ;;  %4042 = vtanh.f32 %v2857_v31 }
 0xcc9   : > { %3834 = vmatmul.mubr.f32.vlgmr.msra.gmra.mxu1 %v2884_v30 }
 0xcca   : > { %v4033_v33 = vpop.eup %4032 }
 0xccb   : > { %v2870_v57 = vadd.f32 1.0, %v4033_v33 }
 0xccc   : > { %v4035_v35 = vpop.eup %4034 }
 0xccd   : > { %v2869_v25 = vadd.f32 1.0, %v4035_v35  ;;  %v2878_v6 = vmul.f32 0.5, %v2870_v57 }
 0xcce   : > { %v4037_v48 = vpop.eup %4036 }
 0xccf   : > { %v2877_v27 = vmul.f32 0.5, %v2869_v25  ;;  %v2872_v62 = vadd.f32 1.0, %v4037_v48  ;;  %v2886_v19 = vmul.f32 %v2878_v6, %v4858_v37  ;;  %v3453_v37 = vld [vmem:[%s5016_s2 + $0x8] ss:$0 sm:$0xff] }
 0xcd0   : > { %v4039_v63 = vpop.eup %4038 }
 0xcd1   : > { %v2885_v39 = vmul.f32 %v2877_v27, %v4862_v38  ;;  %v2871_v0 = vadd.f32 1.0, %v4039_v63  ;;  %v2880_v11 = vmul.f32 0.5, %v2872_v62 }
 0xcd3   : > { %v4041_v14 = vpop.eup %4040  ;;  %3836 = vmatprep.mubr.f32.mxu1 %v2885_v39  ;;  %v2879_v43 = vmul.f32 0.5, %v2871_v0  ;;  %v2888_v49 = vmul.f32 %v2880_v11, %v4867_v40 }
 0xcd4   : > { %3837 = vmatmul.mubr.f32.gmra.mxu1 %v2886_v19  ;;  %v2874_v15 = vadd.f32 1.0, %v4041_v14 }
 0xcd5   : > { %v4043_v58 = vpop.eup %4042  ;;  %v2887_v21 = vmul.f32 %v2879_v43, %v4872_v24 }
 0xcd6   : > { %v2873_v3 = vadd.f32 1.0, %v4043_v58  ;;  %v2882_v29 = vmul.f32 0.5, %v2874_v15 }
 0xcd7   : > { %3839 = vmatprep.mubr.f32.mxu1 %v2887_v21 }
 0xcd8   : > { %3840 = vmatmul.mubr.f32.gmra.mxu1 %v2888_v49  ;;  %v2881_v28 = vmul.f32 0.5, %v2873_v3  ;;  %v2890_v51 = vmul.f32 %v2882_v29, %v4878_v9 }
 0xcda   : > { %v2889_v38 = vmul.f32 %v2881_v28, %v2811_v4 }
 0xcdc   : > { %3842 = vmatprep.mubr.f32.mxu1 %v2889_v38 }
 0xcdd   : > { %3843 = vmatmul.mubr.f32.gmra.mxu1 %v2890_v51 }
 0xd89   : > { %v3835_v52 = vpop.f32.mrf.mxu1 }
 0xd8a   : > { %v2967_v47 = vadd.f32 %v3835_v52, %v3453_v37 }
 0xd8b   : > { %v2961_v32 = vpop.f32.mrf.mxu1 }
 0xd8c   : > { %v3001_v24 = vadd.f32 %v2967_v47, %v4734_v13  ;;  %v2962_v40 = vadd.f32 %v3453_v37, %v2961_v32 }
 0xd8e   : > { %v3000_v18 = vadd.f32 %v2962_v40, %v4737_v36  ;;  %v3011_v42 = vsel %vm377_vm1, %v3001_v24, 0.0 }
 0xd8f   : > { %3012 = vadd.xlane.f32.xlu1 %v3011_v42 }
 0xd90   : > { %v3008_v4 = vsel %vm377_vm1, %v3000_v18, 0.0 }
 0xd91   : > { %3009 = vadd.xlane.f32.xlu0 %v3008_v4 }
 0xd94   : > { %v3838_v9 = vpop.f32.mrf.mxu1 }
 0xd95   : > { %v2977_v10 = vadd.f32 %v3838_v9, %v3453_v37  ;;  %v220_v9 = vld [vmem:[#allocation2 + $0x128] sm:$0xff] }
 0xd96   : > { %v2971_v60 = vpop.f32.mrf.mxu1 }
 0xd97   : > { %v3003_v54 = vadd.f32 %v2977_v10, %v4744_v46  ;;  %v2972_v12 = vadd.f32 %v3453_v37, %v2971_v60  ;;  %v4161_v10 = vmov 0.0   ;;  %v219_v60 = vld [vmem:[#allocation2 + $0x120] sm:$0xff] }
 0xd98   : > { %v3841_v5 = vpop.f32.mrf.mxu1  ;;  %3845 = vmatprep.subr.mxu0 %v4161_v10  ;;  %3853 = vmatprep.mubr.msk.f32.mxu0 %vm4162_vm3, %v4161_v10 }
 0xd99   : > { %v3002_v61 = vadd.f32 %v2972_v12, %v4747_v44  ;;  %v2987_v34 = vadd.f32 %v3841_v5, %v3453_v37  ;;  %v3017_v13 = vsel %vm377_vm1, %v3003_v54, 0.0  ;;  %3846 = vmatpush3.msra.mxu0 %v220_v9  ;;  %v217_v12 = vld [vmem:[#allocation2 + $0x110] sm:$0xff] }
 0xd9a   : > { %3018 = vadd.xlane.f32.xlu1 %v3017_v13  ;;  %v2981_v36 = vpop.f32.mrf.mxu1  ;;  %3847 = vmatprep.subr.mxu0 %v4161_v10 }
 0xd9b   : > { %v3005_v1 = vadd.f32 %v2987_v34, %v4752_v22  ;;  %v2982_v56 = vadd.f32 %v3453_v37, %v2981_v36  ;;  %v3014_v16 = vsel %vm377_vm1, %v3002_v61, 0.0  ;;  %3848 = vmatpush3.msra.mxu0 %v219_v60 }
 0xd9c   : > { %3015 = vadd.xlane.f32.xlu0 %v3014_v16  ;;  %3849 = vmatprep.subr.mxu0 %v4161_v10 }
 0xd9d   : > { %v3004_v2 = vadd.f32 %v2982_v56, %v4755_v53  ;;  %v3844_v7 = vpop.f32.mrf.mxu1  ;;  %v3023_v46 = vsel %vm377_vm1, %v3005_v1, 0.0 }
 0xd9e   : > { %v2997_v45 = vadd.f32 %v3844_v7, %v3453_v37  ;;  %3024 = vadd.xlane.f32.xlu1 %v3023_v46 }
 0xd9f   : > { %v2991_v50 = vpop.f32.mrf.mxu1  ;;  %v3020_v44 = vsel %vm377_vm1, %v3004_v2, 0.0 }
 0xda0   : > { %v3007_v8 = vadd.f32 %v2997_v45, %v4762_v41  ;;  %v2992_v55 = vadd.f32 %v3453_v37, %v2991_v50  ;;  %3021 = vadd.xlane.f32.xlu0 %v3020_v44 }
 0xda2   : > { %v3006_v22 = vadd.f32 %v2992_v55, %v4765_v59  ;;  %v3029_v17 = vsel %vm377_vm1, %v3007_v8, 0.0 }
 0xda3   : > { %3030 = vadd.xlane.f32.xlu1 %v3029_v17 }
 0xda4   : > { %v3026_v20 = vsel %vm377_vm1, %v3006_v22, 0.0 }
 0xda5   : > { %3027 = vadd.xlane.f32.xlu0 %v3026_v20 }
 0xe18   : > { %v3013_v53 = vpop.xlane.xlu1 %3012 }
 0xe19   : > { %v3033_v23 = vmul.f32 0.03125, %v3013_v53 }
 0xe1a   : > { %v3010_v26 = vpop.xlane.xlu0 %3009 }
 0xe1b   : > { %v4914_v30 = vsub.f32 %v3001_v24, %v3033_v23  ;;  %v3032_v31 = vmul.f32 0.03125, %v3010_v26  ;;  %v3454_v23 = vld [vmem:[%s5016_s2 + $0xb] ss:$0 sm:$0xff] }
 0xe1d   : > { %v4916_v33 = vsub.f32 %v3000_v18, %v3032_v31  ;;  %v3049_v41 = vmul.f32 %v4914_v30, %v4914_v30 }
 0xe1f   : > { %v3059_v57 = vsel %vm377_vm1, %v3049_v41, 0.0  ;;  %v3048_v59 = vmul.f32 %v4916_v33, %v4916_v33 }
 0xe20   : > { %3060 = vadd.xlane.f32.xlu1 %v3059_v57 }
 0xe21   : > { %v3056_v35 = vsel %vm377_vm1, %v3048_v59, 0.0 }
 0xe22   : > { %3057 = vadd.xlane.f32.xlu0 %v3056_v35 }
 0xe23   : > { %v3019_v25 = vpop.xlane.xlu1 %3018 }
 0xe24   : > { %v3035_v48 = vmul.f32 0.03125, %v3019_v25 }
 0xe25   : > { %v3016_v6 = vpop.xlane.xlu0 %3015 }
 0xe26   : > { %v4924_v27 = vsub.f32 %v3003_v54, %v3035_v48  ;;  %v3034_v62 = vmul.f32 0.03125, %v3016_v6  ;;  %v218_v54 = vld [vmem:[#allocation2 + $0x118] sm:$0xff] }
 0xe27   : > { %v3025_v63 = vpop.xlane.xlu1 %3024  ;;  %3850 = vmatpush3.msra.mxu0 %v218_v54 }
 0xe28   : > { %v4926_v39 = vsub.f32 %v3002_v61, %v3034_v62  ;;  %v3037_v0 = vmul.f32 0.03125, %v3025_v63  ;;  %v3051_v19 = vmul.f32 %v4924_v27, %v4924_v27  ;;  %3851 = vmatprep.subr.mxu0 %v4161_v10 }
 0xe29   : > { %v3022_v11 = vpop.xlane.xlu0 %3021  ;;  %3852 = vmatpush3.msra.mxu0 %v217_v12 }
 0xe2a   : > { %v4930_v14 = vsub.f32 %v3005_v1, %v3037_v0  ;;  %v3036_v43 = vmul.f32 0.03125, %v3022_v11  ;;  %v3065_v15 = vsel %vm377_vm1, %v3051_v19, 0.0  ;;  %v3050_v58 = vmul.f32 %v4926_v39, %v4926_v39 }
 0xe2b   : > { %3066 = vadd.xlane.f32.xlu1 %v3065_v15 }
 0xe2c   : > { %v4935_v21 = vsub.f32 %v3004_v2, %v3036_v43  ;;  %v3031_v49 = vpop.xlane.xlu1 %3030  ;;  %v3062_v3 = vsel %vm377_vm1, %v3050_v58, 0.0  ;;  %v3053_v29 = vmul.f32 %v4930_v14, %v4930_v14 }
 0xe2d   : > { %v3039_v28 = vmul.f32 0.03125, %v3031_v49  ;;  %3063 = vadd.xlane.f32.xlu0 %v3062_v3 }
 0xe2e   : > { %v3028_v38 = vpop.xlane.xlu0 %3027  ;;  %v3071_v51 = vsel %vm377_vm1, %v3053_v29, 0.0  ;;  %v3052_v37 = vmul.f32 %v4935_v21, %v4935_v21 }
 0xe2f   : > { %v4943_v52 = vsub.f32 %v3007_v8, %v3039_v28  ;;  %v3038_v47 = vmul.f32 0.03125, %v3028_v38  ;;  %3072 = vadd.xlane.f32.xlu1 %v3071_v51 }
 0xe30   : > { %v3068_v32 = vsel %vm377_vm1, %v3052_v37, 0.0 }
 0xe31   : > { %v4946_v24 = vsub.f32 %v3006_v22, %v3038_v47  ;;  %3069 = vadd.xlane.f32.xlu0 %v3068_v32  ;;  %v3055_v40 = vmul.f32 %v4943_v52, %v4943_v52 }
 0xe33   : > { %v3077_v18 = vsel %vm377_vm1, %v3055_v40, 0.0  ;;  %v3054_v42 = vmul.f32 %v4946_v24, %v4946_v24 }
 0xe34   : > { %3078 = vadd.xlane.f32.xlu1 %v3077_v18 }
 0xe35   : > { %v3074_v4 = vsel %vm377_vm1, %v3054_v42, 0.0 }
 0xe36   : > { %3075 = vadd.xlane.f32.xlu0 %v3074_v4 }
 0xea9   : > { %v3061_v5 = vpop.xlane.xlu1 %3060 }
 0xeaa   : > { %v3081_v61 = vmul.f32 0.03125, %v3061_v5 }
 0xeab   : > { %v3058_v34 = vpop.xlane.xlu0 %3057 }
 0xeac   : > { %v3089_v13 = vadd.f32 1e-05, %v3081_v61  ;;  %v3080_v36 = vmul.f32 0.03125, %v3058_v34 }
 0xeae   : > { %4044 = vrsqrt.f32 %v3089_v13  ;;  %v3088_v1 = vadd.f32 1e-05, %v3080_v36 }
 0xeb0   : > { %4046 = vrsqrt.f32 %v3088_v1 }
 0xeb4   : > { %v3067_v56 = vpop.xlane.xlu1 %3066 }
 0xeb5   : > { %v3083_v16 = vmul.f32 0.03125, %v3067_v56 }
 0xeb6   : > { %v3064_v2 = vpop.xlane.xlu0 %3063 }
 0xeb7   : > { %v3091_v7 = vadd.f32 1e-05, %v3083_v16  ;;  %v3082_v46 = vmul.f32 0.03125, %v3064_v2 }
 0xeb8   : > { %v3073_v45 = vpop.xlane.xlu1 %3072 }
 0xeb9   : > { %4048 = vrsqrt.f32 %v3091_v7  ;;  %v3090_v50 = vadd.f32 1e-05, %v3082_v46  ;;  %v3085_v44 = vmul.f32 0.03125, %v3073_v45 }
 0xeba   : > { %v3070_v55 = vpop.xlane.xlu0 %3069 }
 0xebb   : > { %v4045_v8 = vpop.eup %4044  ;;  %4050 = vrsqrt.f32 %v3090_v50  ;;  %v3093_v22 = vadd.f32 1e-05, %v3085_v44  ;;  %v3084_v17 = vmul.f32 0.03125, %v3070_v55 }
 0xebc   : > { %v3105_v53 = vmul.f32 %v4045_v8, %v4914_v30  ;;  %v3455_v30 = vld [vmem:[%s5016_s2 + $0xc] ss:$0 sm:$0xff] }
 0xebd   : > { %v4047_v20 = vpop.eup %4046  ;;  %4052 = vrsqrt.f32 %v3093_v22  ;;  %v3092_v31 = vadd.f32 1e-05, %v3084_v17  ;;  %v3079_v41 = vpop.xlane.xlu1 %3078 }
 0xebe   : > { %v3104_v26 = vmul.f32 %v4047_v20, %v4916_v33  ;;  %v3087_v57 = vmul.f32 0.03125, %v3079_v41  ;;  %v3117_v25 = vmul.f32 %v3454_v23, %v3105_v53 }
 0xebf   : > { %4054 = vrsqrt.f32 %v3092_v31  ;;  %v3076_v35 = vpop.xlane.xlu0 %3075 }
 0xec0   : > { %v3116_v59 = vmul.f32 %v3454_v23, %v3104_v26  ;;  %v3095_v48 = vadd.f32 1e-05, %v3087_v57  ;;  %v3086_v6 = vmul.f32 0.03125, %v3076_v35  ;;  %v3129_v0 = vadd.f32 %v3455_v30, %v3117_v25 }
 0xec2   : > { %v3128_v62 = vadd.f32 %v3455_v30, %v3116_v59  ;;  %4056 = vrsqrt.f32 %v3095_v48  ;;  %v3094_v63 = vadd.f32 1e-05, %v3086_v6  ;;  %v3137_v15 = vsel %vm377_vm1, %v3129_v0, 0.0 }
 0xec4   : > { %4058 = vrsqrt.f32 %v3094_v63  ;;  %v3136_v19 = vsel %vm377_vm1, %v3128_v62, 0.0 }
 0xec5   : > { %v3138_v58 = vadd.f32 %v3137_v15, %v3136_v19 }
 0xec6   : > { %v4049_v33 = vpop.eup %4048 }
 0xec7   : > { %v3107_v11 = vmul.f32 %v4049_v33, %v4924_v27  ;;  %v3139_v18 = vrot.slane %v3138_v58, 4 }
 0xec8   : > { %v4051_v43 = vpop.eup %4050 }
 0xec9   : > { %v3119_v49 = vmul.f32 %v3454_v23, %v3107_v11  ;;  %v3106_v3 = vmul.f32 %v4051_v43, %v4926_v39  ;;  %v3140_v5 = vadd.f32 %v3139_v18, %v3138_v58  ;;  %v3456_v43 = vld [vmem:[%s5016_s2 + $0xd] ss:$0 sm:$0xff] }
 0xeca   : > { %v4053_v29 = vpop.eup %4052 }
 0xecb   : > { %v3131_v28 = vadd.f32 %v3455_v30, %v3119_v49  ;;  %v3118_v38 = vmul.f32 %v3454_v23, %v3106_v3  ;;  %v3109_v51 = vmul.f32 %v4053_v29, %v4930_v14  ;;  %v3141_v2 = vrot.slane %v3140_v5, 2 }
 0xecc   : > { %v4055_v37 = vpop.eup %4054 }
 0xecd   : > { %v3130_v47 = vadd.f32 %v3455_v30, %v3118_v38  ;;  %v3121_v32 = vmul.f32 %v3454_v23, %v3109_v51  ;;  %v3108_v40 = vmul.f32 %v4055_v37, %v4935_v21  ;;  %v3146_v27 = vsel %vm377_vm1, %v3131_v28, 0.0 }
 0xecf   : > { %v4057_v42 = vpop.eup %4056  ;;  %v3145_v4 = vsel %vm377_vm1, %v3130_v47, 0.0  ;;  %v3133_v9 = vadd.f32 %v3455_v30, %v3121_v32  ;;  %v3120_v10 = vmul.f32 %v3454_v23, %v3108_v40 }
 0xed0   : > { %v3147_v60 = vadd.f32 %v3146_v27, %v3145_v4  ;;  %v3111_v39 = vmul.f32 %v4057_v42, %v4943_v52 }
 0xed1   : > { %v4059_v54 = vpop.eup %4058  ;;  %v3132_v12 = vadd.f32 %v3455_v30, %v3120_v10  ;;  %v3155_v21 = vsel %vm377_vm1, %v3133_v9, 0.0 }
 0xed2   : > { %v3123_v14 = vmul.f32 %v3454_v23, %v3111_v39  ;;  %v3110_v61 = vmul.f32 %v4059_v54, %v4946_v24  ;;  %v3148_v34 = vrot.slane %v3147_v60, 4  ;;  %v3142_v24 = vadd.f32 %v3141_v2, %v3140_v5 }
 0xed3   : > { %v3154_v13 = vsel %vm377_vm1, %v3132_v12, 0.0 }
 0xed4   : > { %v3135_v36 = vadd.f32 %v3455_v30, %v3123_v14  ;;  %v3122_v1 = vmul.f32 %v3454_v23, %v3110_v61  ;;  %v3149_v56 = vadd.f32 %v3148_v34, %v3147_v60  ;;  %v3156_v16 = vadd.f32 %v3155_v21, %v3154_v13 }
 0xed5   : > { %v3143_v26 = vrot.slane %v3142_v24, 1 }
 0xed6   : > { %v3134_v7 = vadd.f32 %v3455_v30, %v3122_v1  ;;  %v3150_v46 = vrot.slane %v3149_v56, 2  ;;  %v3157_v45 = vrot.slane %v3156_v16, 4  ;;  %v3164_v8 = vsel %vm377_vm1, %v3135_v36, 0.0 }
 0xed7   : > { %v3144_v35 = vadd.f32 %v3143_v26, %v3142_v24 }
 0xed8   : > { %v3151_v52 = vadd.f32 %v3150_v46, %v3149_v56  ;;  %v3158_v50 = vadd.f32 %v3157_v45, %v3156_v16  ;;  %v3163_v44 = vsel %vm377_vm1, %v3134_v7, 0.0 }
 0xed9   : > { %v3165_v55 = vadd.f32 %v3164_v8, %v3163_v44  ;;  %v3173_v63 = vmul.f32 0.0625, %v3144_v35 }
 0xeda   : > { %v3159_v22 = vrot.slane %v3158_v50, 2  ;;  %v3152_v17 = vrot.slane %v3151_v52, 1 }
 0xedb   : > { %v3166_v20 = vrot.slane %v3165_v55, 4 }
 0xedc   : > { %v3160_v53 = vadd.f32 %v3159_v22, %v3158_v50  ;;  %v3153_v41 = vadd.f32 %v3152_v17, %v3151_v52 }
 0xedd   : > { %v3167_v23 = vadd.f32 %v3166_v20, %v3165_v55 }
 0xede   : > { %v3161_v31 = vrot.slane %v3160_v53, 1  ;;  %v3174_v6 = vmul.f32 0.0625, %v3153_v41 }
 0xedf   : > { %v3168_v57 = vrot.slane %v3167_v23, 2 }
 0xee0   : > { %v3162_v59 = vadd.f32 %v3161_v31, %v3160_v53  ;;  %v3186_v33 = vsel %vm3185_vm4, %v3174_v6, %v3173_v63 }
 0xee1   : > { %v3169_v25 = vadd.f32 %v3168_v57, %v3167_v23 }
 0xee2   : > { %v3175_v30 = vmul.f32 0.0625, %v3162_v59 }
 0xee3   : > { %v3170_v48 = vrot.slane %v3169_v25, 1 }
 0xee4   : > { %v3188_v19 = vsel %vm3187_vm5, %v3175_v30, %v3186_v33 }
 0xee5   : > { %v3171_v62 = vadd.f32 %v3170_v48, %v3169_v25 }
 0xee7   : > { %v3176_v0 = vmul.f32 0.0625, %v3171_v62 }
 0xee9   : > { %v3190_v11 = vsel %vm3189_vm6, %v3176_v0, %v3188_v19 }
 0xeea   : > { %3854 = vmatmul.mubr.msk.f32.vlgmr.msra.gmra.mxu0 %vm377_vm1, %v3190_v11 }
 0xfaa   : > { %v3259_v15 = vpop.f32.mrf.mxu0 }
 0xfab   : > { %v3260_v58 = vadd.f32 %v3456_v43, %v3259_v15 }
 0xfac   : > { %v3855_v49 = vpop.f32.mrf.mxu0 }
 0xfad   : > { %v3264_v3 = vsel %vm3263_vm7, %v3260_v58, 0.0 }
 0xfae   : > { %v3265_v29 = vrot.slane %v3264_v3, 4 }
 0xfb0   : > { %v3266_v28 = vadd.f32 %v3265_v29, %v3264_v3 }
 0xfb2   : > { %v3267_v38 = vrot.slane %v3266_v28, 2 }
 0xfb4   : > { %v3268_v51 = vadd.f32 %v3267_v38, %v3266_v28 }
 0xfb6   : > { %v3269_v37 = vrot.slane %v3268_v51, 1 }
 0xfb8   : > { %v3270_v47 = vadd.f32 %v3269_v37, %v3268_v51 }
 0xfba   : > { %v3272_v32 = vmul.f32 0.25, %v3270_v47 }
 0xfbc   : > { %3274 = vst.msk [vmem:[%s177_s10] sm:$0x1] %vm3273_vm8, %v3272_v32 }
 0xfbd   : > { %4099 = shalt.err (!%p4096_p0)
}
 0xfbe   : > { %s4100_s28 = scalar_lea.hbm %s3286_s20, 16  ;;  %s4104_s4 = scalar_lea.hbm %s5017_s3, 32 }
 0xfbf   : > { %p4101_p1 = scmp.ne.s32.totalorder %s3286_s20, %s4100_s28  ;;  %p4105_p4 = scmp.lt.s32.totalorder %s3286_s20, %s5017_s3 }
 0xfc0   : > { %p4106_p7 = scmp.lt.s32.totalorder %s4104_s4, %s4100_s28 }
 0xfc1   : > { %p4102_p2 = pnand %p4101_p1, %p4222_p5 }
 0xfc2   : > { %p4107_p8 = por %p4106_p7, %p4105_p4 }
 0xfc3   : > { %p4103_p3 = pneg %p4102_p2 }
 0xfc5   : > { %p4108_p6 = pnand %p4107_p8, %p4103_p3 }
 0xfc7   : > { %4111 = shalt.err (!%p4108_p6)
}
 0xfc8   : > { %3860 = dma.vmem_to_hbm [thread:$0]  (%p4222_p5), %s3289_s11, 16, %s3286_s20, %s3276_s24  }
 0xfc9 PF: > { %p3872_p9 = scmp.ge.s32.totalorder %s4150_s15, 2  ;;  %s3300_s7 = sand.u32 1, %s4138_s12  }
 0xfca   : > { %p5021_p10 = scmp.ne.s32.totalorder %s5019_s23, 0  ;;  %s3301_s8 = scalar_lea.sflag [#allocation4], %s3300_s7 }
 0xfcc   : > { %p3867_p11 = pnand %p3872_p9, %p5021_p10 }
 0xfce   : > { %p3868_p12 = pneg %p3867_p11 }
 0xfd0   : > { %4133 = dma.done.wait (%p3868_p12), %s3301_s8, 16  }
 0xfd1   : > { %4135 = vsyncadd (%p3868_p12), %s3301_s8, 4294967280  ;;  %p14_p13 = scmp.ge.s32.totalorder %s4209_s18, 4   ;;  %s5022_s12 = smov %s4142_s13 }
 0xfd2   : > { %s5023_s13 = smov %s4146_s14  ;;  %s5024_s14 = smov %s4220_s21 }
 0xfd3   : > { %s5025_s15 = smov %s4209_s18  ;;  %16 = sbr.rel (!%p14_p13) target bundleno = 4 (0x4), region = 72 }
 0xfd8   :  { %3305 = vsyncpa [#allocation3], 1 }
 0xfd9   :  { %3307 = vsyncpa [#allocation3 + $0x1], 1 }
 0xfda   :  { %3308 = vsyncpa [#allocation4], 1 }
 0xfdb   :  { %3310 = vsyncpa [#allocation4 + $0x1], 1 }

</bundles_post_ra>
